<compile_context>
chip_gen: v7x
topology: tpu7x:2x2x1
jax: 0.10.0
libtpu: 0.0.40
codegen_flags: <defaults>
</compile_context>

<pallas_src>
import functools

import jax
import jax.numpy as jnp
from jax.experimental import pallas as pl
from jax.experimental.pallas import tpu as pltpu


# ---------------------------------------------------------------------------
# In-kernel helpers (operate on loaded values, not refs)
# ---------------------------------------------------------------------------

def _ln(x, g, b, eps=1e-5):
    mu = jnp.mean(x, axis=-1, keepdims=True)
    var = jnp.mean((x - mu) * (x - mu), axis=-1, keepdims=True)
    return (x - mu) * jax.lax.rsqrt(var + eps) * g + b


def _mm(x, w_bf16):
    # MXU-friendly: explicit bf16 operands, f32 accumulation.
    return jnp.dot(x.astype(jnp.bfloat16), w_bf16,
                   preferred_element_type=jnp.float32)


# ---------------------------------------------------------------------------
# Fused transformer stack: one pallas_call per encoder/decoder.
# grid = (B, depth); per-batch activation block resident across depth.
# ---------------------------------------------------------------------------

def _encoder_stack_kernel(x_ref,
                          ln1g_ref, ln1b_ref, wqkv_ref, bqkv_ref,
                          wo_ref, bo_ref, ln2g_ref, ln2b_ref,
                          wff1_ref, bff1_ref, wff2_ref, bff2_ref,
                          lnfg_ref, lnfb_ref,
                          o_ref,
                          qkv_scr, attn_scr,
                          *, heads, dim_head, scale):
    layer = pl.program_id(1)
    last = pl.num_programs(1) - 1
    inner = heads * dim_head

    # Initialize the VMEM-resident activation block from the input on layer 0.
    @pl.when(layer == 0)
    def _():
        o_ref[...] = x_ref[...]

    x = o_ref[0]                                      # (N, D) f32, resident

    # ---- attention block: LN1 -> fused QKV -> per-head MHA -> out-proj -> res
    h = _ln(x, ln1g_ref[0], ln1b_ref[0])
    # bf16 scratch: halves VMEM + vld/vst bytes; matmuls re-cast anyway.
    qkv_scr[...] = (_mm(h, wqkv_ref[0]) + bqkv_ref[0]).astype(jnp.bfloat16)
    # TODO(synk): fully head-batched (heads, N, dh) einsum needs an in-kernel
    # (N, heads, dh) -> (heads, N, dh) relayout; static head loop kept for
    # robust Mosaic lowering (heads is small).
    for hh in range(heads):
        c = hh * dim_head
        q = qkv_scr[:, c:c + dim_head]                          # (N, dh) bf16
        k = qkv_scr[:, inner + c:inner + c + dim_head]
        v = qkv_scr[:, 2 * inner + c:2 * inner + c + dim_head]
        # Contract last axes directly (no explicit transpose of k).
        s = jax.lax.dot_general(q, k, (((1,), (1,)), ((), ())),
                                preferred_element_type=jnp.float32) * scale
        s = s - jnp.max(s, axis=-1, keepdims=True)
        p = jnp.exp(s)
        # EUP approx reciprocal instead of VPU divide.
        p = p * pl.reciprocal(jnp.sum(p, axis=-1, keepdims=True), approx=True)
        attn_scr[:, c:c + dim_head] = jnp.dot(
            p.astype(jnp.bfloat16), v,
            preferred_element_type=jnp.float32).astype(jnp.bfloat16)
    x = x + _mm(attn_scr[...], wo_ref[0]) + bo_ref[0]

    # ---- feed-forward block: LN2 -> FF1(GELU) -> FF2 -> residual
    h = _ln(x, ln2g_ref[0], ln2b_ref[0])
    # TODO(synk): PyTorch nn.GELU defaults to the exact erf form; tanh
    # approximation is used for robust Mosaic lowering (~1e-3 difference).
    h = jax.nn.gelu(_mm(h, wff1_ref[0]) + bff1_ref[0], approximate=True)
    x = x + _mm(h, wff2_ref[0]) + bff2_ref[0]

    # Single store per step: running activation, or final LN on the last layer.
    @pl.when(layer < last)
    def _():
        o_ref[0] = x

    @pl.when(layer == last)
    def _():
        o_ref[0] = _ln(x, lnfg_ref[...], lnfb_ref[...])


def encoder_forward(ep, x3d, *, heads, dim_head):
    """x3d: (B, N, D) f32.  Returns (B, N, D) f32 (input buffer is donated)."""
    B, N, D = x3d.shape
    depth = ep["wqkv"].shape[0]
    inner = heads * dim_head
    ffd = ep["wff1"].shape[-1]
    scale = 1.0 / (dim_head ** 0.5)

    def vec_spec(width):          # params stored as (depth, 1, width)
        return pl.BlockSpec((1, 1, width), lambda b, l: (l, 0, 0))

    def mat_spec(rows, cols):     # params stored as (depth, rows, cols)
        return pl.BlockSpec((1, rows, cols), lambda b, l: (l, 0, 0))

    kern = functools.partial(_encoder_stack_kernel, heads=heads,
                             dim_head=dim_head, scale=scale)
    # TODO(synk): at production dims (dim>=512, long N) add M-tiling for the FF
    # matmuls and raise vmem_limit_bytes to respect v7x's 64 MiB VMEM ceiling.
    return pl.pallas_call(
        kern,
        grid=(B, depth),
        in_specs=[
            pl.BlockSpec((1, N, D), lambda b, l: (b, 0, 0)),  # x (read at l==0)
            vec_spec(D), vec_spec(D),                         # ln1 g/b
            mat_spec(D, 3 * inner), vec_spec(3 * inner),      # wqkv / bqkv
            mat_spec(inner, D), vec_spec(D),                  # wo / bo
            vec_spec(D), vec_spec(D),                         # ln2 g/b
            mat_spec(D, ffd), vec_spec(ffd),                  # ff1
            mat_spec(ffd, D), vec_spec(D),                    # ff2
            pl.BlockSpec((1, D), lambda b, l: (0, 0)),        # final LN g
            pl.BlockSpec((1, D), lambda b, l: (0, 0)),        # final LN b
        ],
        # Same block index across the depth axis => activations stay resident
        # in VMEM; written back to HBM once per batch block.
        out_specs=pl.BlockSpec((1, N, D), lambda b, l: (b, 0, 0)),
        out_shape=jax.ShapeDtypeStruct((B, N, D), jnp.float32),
        scratch_shapes=[pltpu.VMEM((N, 3 * inner), jnp.bfloat16),
                        pltpu.VMEM((N, inner), jnp.bfloat16)],
        input_output_aliases={0: 0},    # donate the activation slab (no extra HBM buffer)
        compiler_params=pltpu.CompilerParams(
            dimension_semantics=("parallel", "arbitrary")),
    )(x3d,
      ep["ln1_g"], ep["ln1_b"], ep["wqkv"], ep["bqkv"],
      ep["wo"], ep["bo"], ep["ln2_g"], ep["ln2_b"],
      ep["wff1"], ep["bff1"], ep["wff2"], ep["bff2"],
      ep["lnf_g"], ep["lnf_b"])


# ---------------------------------------------------------------------------
# Patch embedding (Linear) fused with positional-embedding add, single block
# ---------------------------------------------------------------------------

def _to_tokens_kernel(x_ref, w_ref, b_ref, pos_ref, o_ref):
    o_ref[...] = _mm(x_ref[...], w_ref[...]) + b_ref[...] + pos_ref[...]


def to_tokens(x2d, w, b, pos_tiled):
    """x2d: (B*n, C*p) f32; w: (C*p, dim) bf16; pos_tiled: (B*n, dim) f32."""
    M, Cp = x2d.shape
    dim = w.shape[1]
    return pl.pallas_call(
        _to_tokens_kernel,
        grid=(1,),
        in_specs=[pl.BlockSpec((M, Cp), lambda i: (0, 0)),
                  pl.BlockSpec((Cp, dim), lambda i: (0, 0)),
                  pl.BlockSpec((1, dim), lambda i: (0, 0)),
                  pl.BlockSpec((M, dim), lambda i: (0, 0))],
        out_specs=pl.BlockSpec((M, dim), lambda i: (0, 0)),
        out_shape=jax.ShapeDtypeStruct((M, dim), jnp.float32),
    )(x2d, w, b, pos_tiled)


# ---------------------------------------------------------------------------
# Vector quantizer (Euclidean nearest neighbour, forward/inference semantics)
# ---------------------------------------------------------------------------

def _vq_kernel(x_ref, cb_ref, q_ref, idx_ref):
    x = x_ref[...]
    cb = cb_ref[...]
    K = cb.shape[0]
    x2 = jnp.sum(x * x, axis=-1, keepdims=True)
    c2 = jnp.sum(cb * cb, axis=-1)[None, :]
    # bf16 operands for the MXU cross term; distance / argmin math stays f32.
    xc = jax.lax.dot_general(x.astype(jnp.bfloat16), cb.astype(jnp.bfloat16),
                             (((1,), (1,)), ((), ())),
                             preferred_element_type=jnp.float32)
    d = x2 - 2.0 * xc + c2
    dmin = jnp.min(d, axis=-1, keepdims=True)
    iota = jax.lax.broadcasted_iota(jnp.int32, d.shape, 1)
    idx = jnp.min(jnp.where(d <= dmin, iota, K), axis=-1, keepdims=True)
    idx_ref[...] = idx.astype(jnp.int32)
    onehot = (iota == idx).astype(jnp.bfloat16)
    q_ref[...] = jnp.dot(onehot, cb.astype(jnp.bfloat16),
                         preferred_element_type=jnp.float32)


def vq_quantize(x2d, codebook):
    # TODO(synk): straight-through / commitment / diversity losses and EMA
    # codebook updates (training-time VQ behaviour) are not implemented.
    # TODO(synk): tile over the codebook axis with a running (min, argmin)
    # carry once codebook_size / M grow (full MxK distance matrix here).
    M, D = x2d.shape
    K = codebook.shape[0]
    q, idx = pl.pallas_call(
        _vq_kernel,
        grid=(1,),
        in_specs=[pl.BlockSpec((M, D), lambda i: (0, 0)),
                  pl.BlockSpec((K, D), lambda i: (0, 0))],
        out_specs=[pl.BlockSpec((M, D), lambda i: (0, 0)),
                   pl.BlockSpec((M, 1), lambda i: (0, 0))],
        out_shape=[jax.ShapeDtypeStruct((M, D), jnp.float32),
                   jax.ShapeDtypeStruct((M, 1), jnp.int32)],
    )(x2d, codebook)
    return q, idx[:, 0]


# ---------------------------------------------------------------------------
# Fused tail: tokens_to_sequence Linear + MSE loss (single launch)
# ---------------------------------------------------------------------------

def _project_mse_kernel(x_ref, w_ref, b_ref, t_ref, recon_ref, loss_ref,
                        *, inv_count):
    recon = _mm(x_ref[...], w_ref[...]) + b_ref[...]
    recon_ref[...] = recon
    d = recon - t_ref[...]
    loss_ref[...] = jnp.sum(d * d, keepdims=True) * inv_count


def project_mse(x2d, w, b, target2d):
    """x2d: (B*n, dim); w: (dim, C*p) bf16; target2d: (B*n, C*p) patchified."""
    M, K = x2d.shape
    N = w.shape[1]
    kern = functools.partial(_project_mse_kernel, inv_count=1.0 / (M * N))
    recon, loss = pl.pallas_call(
        kern,
        grid=(1,),
        in_specs=[pl.BlockSpec((M, K), lambda i: (0, 0)),
                  pl.BlockSpec((K, N), lambda i: (0, 0)),
                  pl.BlockSpec((1, N), lambda i: (0, 0)),
                  pl.BlockSpec((M, N), lambda i: (0, 0))],
        out_specs=[pl.BlockSpec((M, N), lambda i: (0, 0)),
                   pl.BlockSpec((1, 1), lambda i: (0, 0))],
        out_shape=[jax.ShapeDtypeStruct((M, N), jnp.float32),
                   jax.ShapeDtypeStruct((1, 1), jnp.float32)],
    )(x2d, w, b, target2d)
    return recon, loss[0, 0]


# ---------------------------------------------------------------------------
# Tokenizer forward
# ---------------------------------------------------------------------------

def tokenizer_forward(params, sequence, cfg, return_codebook_ids=False):
    B, C, T = sequence.shape
    p = cfg["patch_size"]
    dim = cfg["dim"]
    n = T // p                       # num_tokens
    L = cfg["num_latent_tokens"]
    N = n + L

    # sequence_to_tokens: Rearrange('b c (n p) -> b n (c p)') ...
    x2d = (sequence.reshape(B, C, n, p)
                   .transpose(0, 2, 1, 3)
                   .reshape(B * n, C * p))
    # ... + Linear, fused with the positional-embedding add (single block)
    pos = params["pos_emb"][:n]
    pos_tiled = jnp.broadcast_to(pos[None], (B, n, dim)).reshape(B * n, dim)
    tokens = to_tokens(x2d, params["to_tok_w"], params["to_tok_b"],
                       pos_tiled).reshape(B, n, dim)

    # pack with learned latent queries
    latents = jnp.broadcast_to(params["latents"][None], (B, L, dim))
    packed = jnp.concatenate([tokens, latents], axis=1)            # (B, N, dim)

    enc_out = encoder_forward(params["enc"], packed,
                              heads=cfg["heads"], dim_head=cfg["dim_head"])
    latents_out = enc_out[:, n:, :]                                 # unpack

    quantized, indices = vq_quantize(latents_out.reshape(B * L, dim),
                                     params["codebook"])
    indices = indices.reshape(B, L)
    if return_codebook_ids:
        return indices
    quantized = quantized.reshape(B, L, dim)

    # decode: mask tokens = pos-emb rows (as in the reference), pack with quantized
    mask_tokens = jnp.broadcast_to(pos[None], (B, n, dim))
    dec_in = jnp.concatenate([mask_tokens, quantized], axis=1)     # (B, N, dim)
    dec_out = encoder_forward(params["dec"], dec_in,
                              heads=cfg["heads"], dim_head=cfg["dim_head"])
    dec_tokens = dec_out[:, :n, :].reshape(B * n, dim)

    # tokens_to_sequence Linear fused with the MSE loss (patchified layout,
    # identical to MSE on (B, C, T) since it is a pure permutation).
    recon2d, recon_loss = project_mse(dec_tokens, params["to_seq_w"],
                                      params["to_seq_b"], x2d)
    recon = (recon2d.reshape(B, n, C, p)
                    .transpose(0, 2, 1, 3)
                    .reshape(B, C, n * p))[:, :, :T]

    return recon_loss, recon, indices


# ---------------------------------------------------------------------------
# Deterministic parameter init (matmul weights stored in bf16, depth-stacked)
# ---------------------------------------------------------------------------

def init_params(key, cfg):
    dim = cfg["dim"]
    dim_patch = cfg["channels"] * cfg["patch_size"]
    inner = cfg["heads"] * cfg["dim_head"]
    ffd = 4 * dim

    kit = iter(jax.random.split(key, 64))

    def nrm(shape, std=0.02, dtype=jnp.float32):
        return (jax.random.normal(next(kit), shape, jnp.float32) * std).astype(dtype)

    def make_encoder(depth):
        return dict(
            ln1_g=jnp.ones((depth, 1, dim), jnp.float32),
            ln1_b=jnp.zeros((depth, 1, dim), jnp.float32),
            wqkv=nrm((depth, dim, 3 * inner), dtype=jnp.bfloat16),
            bqkv=jnp.zeros((depth, 1, 3 * inner), jnp.float32),
            wo=nrm((depth, inner, dim), dtype=jnp.bfloat16),
            bo=jnp.zeros((depth, 1, dim), jnp.float32),
            ln2_g=jnp.ones((depth, 1, dim), jnp.float32),
            ln2_b=jnp.zeros((depth, 1, dim), jnp.float32),
            wff1=nrm((depth, dim, ffd), dtype=jnp.bfloat16),
            bff1=jnp.zeros((depth, 1, ffd), jnp.float32),
            wff2=nrm((depth, ffd, dim), dtype=jnp.bfloat16),
            bff2=jnp.zeros((depth, 1, dim), jnp.float32),
            lnf_g=jnp.ones((1, dim), jnp.float32),
            lnf_b=jnp.zeros((1, dim), jnp.float32),
        )

    return dict(
        latents=nrm((cfg["num_latent_tokens"], dim)),
        pos_emb=nrm((1024, dim)),
        to_tok_w=nrm((dim_patch, dim), dtype=jnp.bfloat16),
        to_tok_b=jnp.zeros((1, dim), jnp.float32),
        to_seq_w=nrm((dim, dim_patch), dtype=jnp.bfloat16),
        to_seq_b=jnp.zeros((1, dim_patch), jnp.float32),
        codebook=nrm((cfg["codebook_size"], dim), std=1.0),
        enc=make_encoder(cfg["enc_depth"]),
        dec=make_encoder(cfg["dec_depth"]),
    )


# ---------------------------------------------------------------------------
# Main
# ---------------------------------------------------------------------------

if __name__ == "__main__":
    # Small, module-consistent shapes.
    cfg = dict(
        dim=32,
        seq_length=64,
        patch_size=8,
        channels=4,
        latent_ratio=0.5,
        enc_depth=2,
        dec_depth=2,
        heads=2,
        dim_head=16,
        codebook_size=16,
    )
    cfg["num_tokens"] = cfg["seq_length"] // cfg["patch_size"]
    cfg["num_latent_tokens"] = int(cfg["num_tokens"] * cfg["latent_ratio"])

    key = jax.random.PRNGKey(0)
    k_param, k_data = jax.random.split(key)
    params = init_params(k_param, cfg)

    B = 2
    sequence = jax.random.normal(
        k_data, (B, cfg["channels"], cfg["seq_length"]), jnp.float32)

    fwd = jax.jit(functools.partial(tokenizer_forward, params, cfg=cfg))
    recon_loss, recon_sequence, codebook_ids = fwd(sequence)
    jax.block_until_ready((recon_loss, recon_sequence, codebook_ids))

    assert recon_sequence.shape == sequence.shape
    assert codebook_ids.shape == (B, cfg["num_latent_tokens"])
    assert recon_loss.shape == ()

    print("KERNEL_OK")
</pallas_src>

<mosaic_0001>
module attributes {stable_mosaic.version = 11 : i64} {
  func.func @_to_tokens_kernel(%arg0: i32, %arg1: memref<16x32xf32, #tpu.memory_space<vmem>>, %arg2: memref<32x32xbf16, #tpu.memory_space<vmem>>, %arg3: memref<1x32xf32, #tpu.memory_space<vmem>>, %arg4: memref<16x32xf32, #tpu.memory_space<vmem>>, %arg5: memref<16x32xf32, #tpu.memory_space<vmem>>) attributes {dimension_semantics = [#tpu.dimension_semantics<arbitrary>], iteration_bounds = array<i64: 1>, scalar_prefetch = 0 : i64, scratch_operands = 0 : i64, tpu.core_type = #tpu.core_type<tc>, window_params = [{pipeline_mode = #tpu.pipeline_mode<synchronous>, transform_indices = @transform_0, window_bounds = array<i64: 16, 32>}, {pipeline_mode = #tpu.pipeline_mode<synchronous>, transform_indices = @transform_1, window_bounds = array<i64: 32, 32>}, {pipeline_mode = #tpu.pipeline_mode<synchronous>, transform_indices = @transform_2, window_bounds = array<i64: 1, 32>}, {pipeline_mode = #tpu.pipeline_mode<synchronous>, transform_indices = @transform_3, window_bounds = array<i64: 16, 32>}, {pipeline_mode = #tpu.pipeline_mode<synchronous>, transform_indices = @transform_4, window_bounds = array<i64: 16, 32>}]} {
    %c0 = arith.constant 0 : index
    %c0_0 = arith.constant 0 : index
    %0 = vector.load %arg1[%c0, %c0_0] : memref<16x32xf32, #tpu.memory_space<vmem>>, vector<16x32xf32>
    %c0_1 = arith.constant 0 : index
    %c0_2 = arith.constant 0 : index
    %1 = vector.load %arg2[%c0_1, %c0_2] : memref<32x32xbf16, #tpu.memory_space<vmem>>, vector<32x32xbf16>
    %2 = arith.truncf %0 : vector<16x32xf32> to vector<16x32xbf16>
    %cst = arith.constant dense<0.000000e+00> : vector<16x32xf32>
    %3 = tpu.matmul %2, %1, %cst {dimension_numbers = #tpu.dot_dimension_numbers<[1], [0], [0], [1], [0, 0, 1, 1], [], []>} : vector<16x32xbf16>, vector<32x32xbf16>, vector<16x32xf32> -> vector<16x32xf32>
    %c0_3 = arith.constant 0 : index
    %c0_4 = arith.constant 0 : index
    %4 = vector.load %arg3[%c0_3, %c0_4] : memref<1x32xf32, #tpu.memory_space<vmem>>, vector<1x32xf32>
    %5 = vector.broadcast %4 : vector<1x32xf32> to vector<16x32xf32>
    %6 = arith.addf %3, %5 : vector<16x32xf32>
    %c0_5 = arith.constant 0 : index
    %c0_6 = arith.constant 0 : index
    %7 = vector.load %arg4[%c0_5, %c0_6] : memref<16x32xf32, #tpu.memory_space<vmem>>, vector<16x32xf32>
    %8 = arith.addf %6, %7 : vector<16x32xf32>
    %c0_7 = arith.constant 0 : index
    %c0_8 = arith.constant 0 : index
    %9 = vector.load %arg5[%c0_7, %c0_8] : memref<16x32xf32, #tpu.memory_space<vmem>>, vector<16x32xf32>
    tpu.vector_store %arg5[%c0_7, %c0_8], %8 {strides = array<i32>} : memref<16x32xf32, #tpu.memory_space<vmem>>, vector<16x32xf32>,
    return
  }
  func.func @transform_0(%arg0: i32) -> (i32, i32) {
    %c0_i32 = arith.constant 0 : i32
    %c0_i32_0 = arith.constant 0 : i32
    %c0_i32_1 = arith.constant 0 : i32
    return %c0_i32, %c0_i32_0 : i32, i32
  }
  func.func @transform_1(%arg0: i32) -> (i32, i32) {
    %c0_i32 = arith.constant 0 : i32
    %c0_i32_0 = arith.constant 0 : i32
    %c0_i32_1 = arith.constant 0 : i32
    return %c0_i32, %c0_i32_0 : i32, i32
  }
  func.func @transform_2(%arg0: i32) -> (i32, i32) {
    %c0_i32 = arith.constant 0 : i32
    %c0_i32_0 = arith.constant 0 : i32
    %c0_i32_1 = arith.constant 0 : i32
    return %c0_i32, %c0_i32_0 : i32, i32
  }
  func.func @transform_3(%arg0: i32) -> (i32, i32) {
    %c0_i32 = arith.constant 0 : i32
    %c0_i32_0 = arith.constant 0 : i32
    %c0_i32_1 = arith.constant 0 : i32
    return %c0_i32, %c0_i32_0 : i32, i32
  }
  func.func @transform_4(%arg0: i32) -> (i32, i32) {
    %c0_i32 = arith.constant 0 : i32
    %c0_i32_0 = arith.constant 0 : i32
    %c0_i32_1 = arith.constant 0 : i32
    return %c0_i32, %c0_i32_0 : i32, i32
  }
}

module attributes {stable_mosaic.version = 11 : i64} {
  func.func @_encoder_stack_kernel(%arg0: i32, %arg1: i32, %arg2: memref<1x12x32xf32, #tpu.memory_space<vmem>>, %arg3: memref<1x1x32xf32, #tpu.memory_space<vmem>>, %arg4: memref<1x1x32xf32, #tpu.memory_space<vmem>>, %arg5: memref<1x32x96xbf16, #tpu.memory_space<vmem>>, %arg6: memref<1x1x96xf32, #tpu.memory_space<vmem>>, %arg7: memref<1x32x32xbf16, #tpu.memory_space<vmem>>, %arg8: memref<1x1x32xf32, #tpu.memory_space<vmem>>, %arg9: memref<1x1x32xf32, #tpu.memory_space<vmem>>, %arg10: memref<1x1x32xf32, #tpu.memory_space<vmem>>, %arg11: memref<1x32x128xbf16, #tpu.memory_space<vmem>>, %arg12: memref<1x1x128xf32, #tpu.memory_space<vmem>>, %arg13: memref<1x128x32xbf16, #tpu.memory_space<vmem>>, %arg14: memref<1x1x32xf32, #tpu.memory_space<vmem>>, %arg15: memref<1x32xf32, #tpu.memory_space<vmem>>, %arg16: memref<1x32xf32, #tpu.memory_space<vmem>>, %arg17: memref<1x12x32xf32, #tpu.memory_space<vmem>>, %arg18: memref<12x96xbf16, #tpu.memory_space<vmem>>, %arg19: memref<12x32xbf16, #tpu.memory_space<vmem>>) attributes {dimension_semantics = [#tpu.dimension_semantics<parallel>, #tpu.dimension_semantics<arbitrary>], iteration_bounds = array<i64: 2, 2>, scalar_prefetch = 0 : i64, scratch_operands = 2 : i64, tpu.core_type = #tpu.core_type<tc>, window_params = [{transform_indices = @transform_0, window_bounds = array<i64: 1, 12, 32>}, {transform_indices = @transform_1, window_bounds = array<i64: 1, 1, 32>}, {transform_indices = @transform_2, window_bounds = array<i64: 1, 1, 32>}, {transform_indices = @transform_3, window_bounds = array<i64: 1, 32, 96>}, {transform_indices = @transform_4, window_bounds = array<i64: 1, 1, 96>}, {transform_indices = @transform_5, window_bounds = array<i64: 1, 32, 32>}, {transform_indices = @transform_6, window_bounds = array<i64: 1, 1, 32>}, {transform_indices = @transform_7, window_bounds = array<i64: 1, 1, 32>}, {transform_indices = @transform_8, window_bounds = array<i64: 1, 1, 32>}, {transform_indices = @transform_9, window_bounds = array<i64: 1, 32, 128>}, {transform_indices = @transform_10, window_bounds = array<i64: 1, 1, 128>}, {transform_indices = @transform_11, window_bounds = array<i64: 1, 128, 32>}, {transform_indices = @transform_12, window_bounds = array<i64: 1, 1, 32>}, {pipeline_mode = #tpu.pipeline_mode<synchronous>, transform_indices = @transform_13, window_bounds = array<i64: 1, 32>}, {pipeline_mode = #tpu.pipeline_mode<synchronous>, transform_indices = @transform_14, window_bounds = array<i64: 1, 32>}, {transform_indices = @transform_15, window_bounds = array<i64: 1, 12, 32>}]} {
    %c0_i32 = arith.constant 0 : i32
    %0 = arith.cmpi eq, %arg1, %c0_i32 : i32
    %1 = arith.extui %0 : i1 to i32
    %c0_i32_0 = arith.constant 0 : i32
    %2 = arith.cmpi ne, %1, %c0_i32_0 : i32
    scf.if %2 {
      %c0_84 = arith.constant 0 : index
      %c0_85 = arith.constant 0 : index
      %c0_86 = arith.constant 0 : index
      %156 = vector.load %arg2[%c0_84, %c0_85, %c0_86] : memref<1x12x32xf32, #tpu.memory_space<vmem>>, vector<1x12x32xf32>
      %c0_87 = arith.constant 0 : index
      %c0_88 = arith.constant 0 : index
      %c0_89 = arith.constant 0 : index
      %157 = vector.load %arg17[%c0_87, %c0_88, %c0_89] : memref<1x12x32xf32, #tpu.memory_space<vmem>>, vector<1x12x32xf32>
      tpu.vector_store %arg17[%c0_87, %c0_88, %c0_89], %156 {strides = array<i32>} : memref<1x12x32xf32, #tpu.memory_space<vmem>>, vector<1x12x32xf32>,
    } else {
    }
    %c0 = arith.constant 0 : index
    %c0_1 = arith.constant 0 : index
    %c0_2 = arith.constant 0 : index
    %3 = vector.load %arg17[%c0, %c0_1, %c0_2] : memref<1x12x32xf32, #tpu.memory_space<vmem>>, vector<1x12x32xf32>
    %4 = vector.shape_cast %3 : vector<1x12x32xf32> to vector<12x32xf32>
    %c0_3 = arith.constant 0 : index
    %c0_4 = arith.constant 0 : index
    %c0_5 = arith.constant 0 : index
    %5 = vector.load %arg3[%c0_3, %c0_4, %c0_5] : memref<1x1x32xf32, #tpu.memory_space<vmem>>, vector<1x1x32xf32>
    %6 = vector.shape_cast %5 : vector<1x1x32xf32> to vector<1x32xf32>
    %c0_6 = arith.constant 0 : index
    %c0_7 = arith.constant 0 : index
    %c0_8 = arith.constant 0 : index
    %7 = vector.load %arg4[%c0_6, %c0_7, %c0_8] : memref<1x1x32xf32, #tpu.memory_space<vmem>>, vector<1x1x32xf32>
    %8 = vector.shape_cast %7 : vector<1x1x32xf32> to vector<1x32xf32>
    %cst = arith.constant dense<0.000000e+00> : vector<12xf32>
    %9 = vector.multi_reduction <add>, %4, %cst [1] : vector<12x32xf32> to vector<12xf32>
    %10 = vector.shape_cast %9 : vector<12xf32> to vector<12x1xf32>
    %cst_9 = arith.constant 3.200000e+01 : f32
    %11 = vector.broadcast %cst_9 : f32 to vector<12x1xf32>
    %12 = arith.divf %10, %11 : vector<12x1xf32>
    %13 = vector.broadcast %12 : vector<12x1xf32> to vector<12x32xf32>
    %14 = arith.subf %4, %13 : vector<12x32xf32>
    %15 = vector.broadcast %12 : vector<12x1xf32> to vector<12x32xf32>
    %16 = arith.subf %4, %15 : vector<12x32xf32>
    %17 = arith.mulf %14, %16 : vector<12x32xf32>
    %cst_10 = arith.constant dense<0.000000e+00> : vector<12xf32>
    %18 = vector.multi_reduction <add>, %17, %cst_10 [1] : vector<12x32xf32> to vector<12xf32>
    %19 = vector.shape_cast %18 : vector<12xf32> to vector<12x1xf32>
    %cst_11 = arith.constant 3.200000e+01 : f32
    %20 = vector.broadcast %cst_11 : f32 to vector<12x1xf32>
    %21 = arith.divf %19, %20 : vector<12x1xf32>
    %22 = vector.broadcast %12 : vector<12x1xf32> to vector<12x32xf32>
    %23 = arith.subf %4, %22 : vector<12x32xf32>
    %cst_12 = arith.constant 9.99999974E-6 : f32
    %24 = vector.broadcast %cst_12 : f32 to vector<12x1xf32>
    %25 = arith.addf %21, %24 : vector<12x1xf32>
    %26 = math.rsqrt %25 : vector<12x1xf32>
    %27 = vector.broadcast %26 : vector<12x1xf32> to vector<12x32xf32>
    %28 = arith.mulf %23, %27 : vector<12x32xf32>
    %29 = vector.broadcast %6 : vector<1x32xf32> to vector<12x32xf32>
    %30 = arith.mulf %28, %29 : vector<12x32xf32>
    %31 = vector.broadcast %8 : vector<1x32xf32> to vector<12x32xf32>
    %32 = arith.addf %30, %31 : vector<12x32xf32>
    %c0_13 = arith.constant 0 : index
    %c0_14 = arith.constant 0 : index
    %c0_15 = arith.constant 0 : index
    %33 = vector.load %arg5[%c0_13, %c0_14, %c0_15] : memref<1x32x96xbf16, #tpu.memory_space<vmem>>, vector<1x32x96xbf16>
    %34 = vector.shape_cast %33 : vector<1x32x96xbf16> to vector<32x96xbf16>
    %35 = arith.truncf %32 : vector<12x32xf32> to vector<12x32xbf16>
    %cst_16 = arith.constant dense<0.000000e+00> : vector<12x96xf32>
    %36 = tpu.matmul %35, %34, %cst_16 {dimension_numbers = #tpu.dot_dimension_numbers<[1], [0], [0], [1], [0, 0, 1, 1], [], []>} : vector<12x32xbf16>, vector<32x96xbf16>, vector<12x96xf32> -> vector<12x96xf32>
    %c0_17 = arith.constant 0 : index
    %c0_18 = arith.constant 0 : index
    %c0_19 = arith.constant 0 : index
    %37 = vector.load %arg6[%c0_17, %c0_18, %c0_19] : memref<1x1x96xf32, #tpu.memory_space<vmem>>, vector<1x1x96xf32>
    %38 = vector.shape_cast %37 : vector<1x1x96xf32> to vector<1x96xf32>
    %39 = vector.broadcast %38 : vector<1x96xf32> to vector<12x96xf32>
    %40 = arith.addf %36, %39 : vector<12x96xf32>
    %41 = arith.truncf %40 : vector<12x96xf32> to vector<12x96xbf16>
    %c0_20 = arith.constant 0 : index
    %c0_21 = arith.constant 0 : index
    %42 = vector.load %arg18[%c0_20, %c0_21] : memref<12x96xbf16, #tpu.memory_space<vmem>>, vector<12x96xbf16>
    tpu.vector_store %arg18[%c0_20, %c0_21], %41 {strides = array<i32>} : memref<12x96xbf16, #tpu.memory_space<vmem>>, vector<12x96xbf16>,
    %c0_22 = arith.constant 0 : index
    %c0_23 = arith.constant 0 : index
    %43 = vector.load %arg18[%c0_22, %c0_23] : memref<12x96xbf16, #tpu.memory_space<vmem>>, vector<12x16xbf16>
    %c0_24 = arith.constant 0 : index
    %c32 = arith.constant 32 : index
    %44 = vector.load %arg18[%c0_24, %c32] : memref<12x96xbf16, #tpu.memory_space<vmem>>, vector<12x16xbf16>
    %c0_25 = arith.constant 0 : index
    %c64 = arith.constant 64 : index
    %45 = vector.load %arg18[%c0_25, %c64] : memref<12x96xbf16, #tpu.memory_space<vmem>>, vector<12x16xbf16>
    %cst_26 = arith.constant dense<0.000000e+00> : vector<12x12xf32>
    %46 = tpu.matmul %43, %44, %cst_26 {dimension_numbers = #tpu.dot_dimension_numbers<[1], [1], [0], [0], [0, 0, 1, 0], [], []>} : vector<12x16xbf16>, vector<12x16xbf16>, vector<12x12xf32> -> vector<12x12xf32>
    %cst_27 = arith.constant 2.500000e-01 : f32
    %47 = vector.broadcast %cst_27 : f32 to vector<12x12xf32>
    %48 = arith.mulf %46, %47 : vector<12x12xf32>
    %cst_28 = arith.constant dense<0xFF800000> : vector<12xf32>
    %49 = vector.multi_reduction <maximumf>, %48, %cst_28 [1] : vector<12x12xf32> to vector<12xf32>
    %50 = vector.shape_cast %49 : vector<12xf32> to vector<12x1xf32>
    %51 = vector.broadcast %50 : vector<12x1xf32> to vector<12x12xf32>
    %52 = arith.subf %48, %51 : vector<12x12xf32>
    %53 = math.exp %52 : vector<12x12xf32>
    %cst_29 = arith.constant dense<0.000000e+00> : vector<12xf32>
    %54 = vector.multi_reduction <add>, %53, %cst_29 [1] : vector<12x12xf32> to vector<12xf32>
    %55 = vector.shape_cast %54 : vector<12xf32> to vector<12x1xf32>
    %56 = tpu.reciprocal %55 {approx = true} : vector<12x1xf32> -> vector<12x1xf32>
    %57 = vector.broadcast %56 : vector<12x1xf32> to vector<12x12xf32>
    %58 = arith.mulf %53, %57 : vector<12x12xf32>
    %59 = arith.truncf %58 : vector<12x12xf32> to vector<12x12xbf16>
    %cst_30 = arith.constant dense<0.000000e+00> : vector<12x16xf32>
    %60 = tpu.matmul %59, %45, %cst_30 {dimension_numbers = #tpu.dot_dimension_numbers<[1], [0], [0], [1], [0, 0, 1, 1], [], []>} : vector<12x12xbf16>, vector<12x16xbf16>, vector<12x16xf32> -> vector<12x16xf32>
    %61 = arith.truncf %60 : vector<12x16xf32> to vector<12x16xbf16>
    %c0_31 = arith.constant 0 : index
    %c0_32 = arith.constant 0 : index
    %62 = vector.load %arg19[%c0_31, %c0_32] : memref<12x32xbf16, #tpu.memory_space<vmem>>, vector<12x16xbf16>
    tpu.vector_store %arg19[%c0_31, %c0_32], %61 {strides = array<i32>} : memref<12x32xbf16, #tpu.memory_space<vmem>>, vector<12x16xbf16>,
    %c0_33 = arith.constant 0 : index
    %c16 = arith.constant 16 : index
    %63 = vector.load %arg18[%c0_33, %c16] : memref<12x96xbf16, #tpu.memory_space<vmem>>, vector<12x16xbf16>
    %c0_34 = arith.constant 0 : index
    %c48 = arith.constant 48 : index
    %64 = vector.load %arg18[%c0_34, %c48] : memref<12x96xbf16, #tpu.memory_space<vmem>>, vector<12x16xbf16>
    %c0_35 = arith.constant 0 : index
    %c80 = arith.constant 80 : index
    %65 = vector.load %arg18[%c0_35, %c80] : memref<12x96xbf16, #tpu.memory_space<vmem>>, vector<12x16xbf16>
    %cst_36 = arith.constant dense<0.000000e+00> : vector<12x12xf32>
    %66 = tpu.matmul %63, %64, %cst_36 {dimension_numbers = #tpu.dot_dimension_numbers<[1], [1], [0], [0], [0, 0, 1, 0], [], []>} : vector<12x16xbf16>, vector<12x16xbf16>, vector<12x12xf32> -> vector<12x12xf32>
    %cst_37 = arith.constant 2.500000e-01 : f32
    %67 = vector.broadcast %cst_37 : f32 to vector<12x12xf32>
    %68 = arith.mulf %66, %67 : vector<12x12xf32>
    %cst_38 = arith.constant dense<0xFF800000> : vector<12xf32>
    %69 = vector.multi_reduction <maximumf>, %68, %cst_38 [1] : vector<12x12xf32> to vector<12xf32>
    %70 = vector.shape_cast %69 : vector<12xf32> to vector<12x1xf32>
    %71 = vector.broadcast %70 : vector<12x1xf32> to vector<12x12xf32>
    %72 = arith.subf %68, %71 : vector<12x12xf32>
    %73 = math.exp %72 : vector<12x12xf32>
    %cst_39 = arith.constant dense<0.000000e+00> : vector<12xf32>
    %74 = vector.multi_reduction <add>, %73, %cst_39 [1] : vector<12x12xf32> to vector<12xf32>
    %75 = vector.shape_cast %74 : vector<12xf32> to vector<12x1xf32>
    %76 = tpu.reciprocal %75 {approx = true} : vector<12x1xf32> -> vector<12x1xf32>
    %77 = vector.broadcast %76 : vector<12x1xf32> to vector<12x12xf32>
    %78 = arith.mulf %73, %77 : vector<12x12xf32>
    %79 = arith.truncf %78 : vector<12x12xf32> to vector<12x12xbf16>
    %cst_40 = arith.constant dense<0.000000e+00> : vector<12x16xf32>
    %80 = tpu.matmul %79, %65, %cst_40 {dimension_numbers = #tpu.dot_dimension_numbers<[1], [0], [0], [1], [0, 0, 1, 1], [], []>} : vector<12x12xbf16>, vector<12x16xbf16>, vector<12x16xf32> -> vector<12x16xf32>
    %81 = arith.truncf %80 : vector<12x16xf32> to vector<12x16xbf16>
    %c0_41 = arith.constant 0 : index
    %c16_42 = arith.constant 16 : index
    %82 = vector.load %arg19[%c0_41, %c16_42] : memref<12x32xbf16, #tpu.memory_space<vmem>>, vector<12x16xbf16>
    tpu.vector_store %arg19[%c0_41, %c16_42], %81 {strides = array<i32>} : memref<12x32xbf16, #tpu.memory_space<vmem>>, vector<12x16xbf16>,
    %c0_43 = arith.constant 0 : index
    %c0_44 = arith.constant 0 : index
    %83 = vector.load %arg19[%c0_43, %c0_44] : memref<12x32xbf16, #tpu.memory_space<vmem>>, vector<12x32xbf16>
    %c0_45 = arith.constant 0 : index
    %c0_46 = arith.constant 0 : index
    %c0_47 = arith.constant 0 : index
    %84 = vector.load %arg7[%c0_45, %c0_46, %c0_47] : memref<1x32x32xbf16, #tpu.memory_space<vmem>>, vector<1x32x32xbf16>
    %85 = vector.shape_cast %84 : vector<1x32x32xbf16> to vector<32x32xbf16>
    %cst_48 = arith.constant dense<0.000000e+00> : vector<12x32xf32>
    %86 = tpu.matmul %83, %85, %cst_48 {dimension_numbers = #tpu.dot_dimension_numbers<[1], [0], [0], [1], [0, 0, 1, 1], [], []>} : vector<12x32xbf16>, vector<32x32xbf16>, vector<12x32xf32> -> vector<12x32xf32>
    %87 = arith.addf %4, %86 : vector<12x32xf32>
    %c0_49 = arith.constant 0 : index
    %c0_50 = arith.constant 0 : index
    %c0_51 = arith.constant 0 : index
    %88 = vector.load %arg8[%c0_49, %c0_50, %c0_51] : memref<1x1x32xf32, #tpu.memory_space<vmem>>, vector<1x1x32xf32>
    %89 = vector.shape_cast %88 : vector<1x1x32xf32> to vector<1x32xf32>
    %90 = vector.broadcast %89 : vector<1x32xf32> to vector<12x32xf32>
    %91 = arith.addf %87, %90 : vector<12x32xf32>
    %c0_52 = arith.constant 0 : index
    %c0_53 = arith.constant 0 : index
    %c0_54 = arith.constant 0 : index
    %92 = vector.load %arg9[%c0_52, %c0_53, %c0_54] : memref<1x1x32xf32, #tpu.memory_space<vmem>>, vector<1x1x32xf32>
    %93 = vector.shape_cast %92 : vector<1x1x32xf32> to vector<1x32xf32>
    %c0_55 = arith.constant 0 : index
    %c0_56 = arith.constant 0 : index
    %c0_57 = arith.constant 0 : index
    %94 = vector.load %arg10[%c0_55, %c0_56, %c0_57] : memref<1x1x32xf32, #tpu.memory_space<vmem>>, vector<1x1x32xf32>
    %95 = vector.shape_cast %94 : vector<1x1x32xf32> to vector<1x32xf32>
    %cst_58 = arith.constant dense<0.000000e+00> : vector<12xf32>
    %96 = vector.multi_reduction <add>, %91, %cst_58 [1] : vector<12x32xf32> to vector<12xf32>
    %97 = vector.shape_cast %96 : vector<12xf32> to vector<12x1xf32>
    %cst_59 = arith.constant 3.200000e+01 : f32
    %98 = vector.broadcast %cst_59 : f32 to vector<12x1xf32>
    %99 = arith.divf %97, %98 : vector<12x1xf32>
    %100 = vector.broadcast %99 : vector<12x1xf32> to vector<12x32xf32>
    %101 = arith.subf %91, %100 : vector<12x32xf32>
    %102 = vector.broadcast %99 : vector<12x1xf32> to vector<12x32xf32>
    %103 = arith.subf %91, %102 : vector<12x32xf32>
    %104 = arith.mulf %101, %103 : vector<12x32xf32>
    %cst_60 = arith.constant dense<0.000000e+00> : vector<12xf32>
    %105 = vector.multi_reduction <add>, %104, %cst_60 [1] : vector<12x32xf32> to vector<12xf32>
    %106 = vector.shape_cast %105 : vector<12xf32> to vector<12x1xf32>
    %cst_61 = arith.constant 3.200000e+01 : f32
    %107 = vector.broadcast %cst_61 : f32 to vector<12x1xf32>
    %108 = arith.divf %106, %107 : vector<12x1xf32>
    %109 = vector.broadcast %99 : vector<12x1xf32> to vector<12x32xf32>
    %110 = arith.subf %91, %109 : vector<12x32xf32>
    %cst_62 = arith.constant 9.99999974E-6 : f32
    %111 = vector.broadcast %cst_62 : f32 to vector<12x1xf32>
    %112 = arith.addf %108, %111 : vector<12x1xf32>
    %113 = math.rsqrt %112 : vector<12x1xf32>
    %114 = vector.broadcast %113 : vector<12x1xf32> to vector<12x32xf32>
    %115 = arith.mulf %110, %114 : vector<12x32xf32>
    %116 = vector.broadcast %93 : vector<1x32xf32> to vector<12x32xf32>
    %117 = arith.mulf %115, %116 : vector<12x32xf32>
    %118 = vector.broadcast %95 : vector<1x32xf32> to vector<12x32xf32>
    %119 = arith.addf %117, %118 : vector<12x32xf32>
    %c0_63 = arith.constant 0 : index
    %c0_64 = arith.constant 0 : index
    %c0_65 = arith.constant 0 : index
    %120 = vector.load %arg11[%c0_63, %c0_64, %c0_65] : memref<1x32x128xbf16, #tpu.memory_space<vmem>>, vector<1x32x128xbf16>
    %121 = vector.shape_cast %120 : vector<1x32x128xbf16> to vector<32x128xbf16>
    %122 = arith.truncf %119 : vector<12x32xf32> to vector<12x32xbf16>
    %cst_66 = arith.constant dense<0.000000e+00> : vector<12x128xf32>
    %123 = tpu.matmul %122, %121, %cst_66 {dimension_numbers = #tpu.dot_dimension_numbers<[1], [0], [0], [1], [0, 0, 1, 1], [], []>} : vector<12x32xbf16>, vector<32x128xbf16>, vector<12x128xf32> -> vector<12x128xf32>
    %c0_67 = arith.constant 0 : index
    %c0_68 = arith.constant 0 : index
    %c0_69 = arith.constant 0 : index
    %124 = vector.load %arg12[%c0_67, %c0_68, %c0_69] : memref<1x1x128xf32, #tpu.memory_space<vmem>>, vector<1x1x128xf32>
    %125 = vector.shape_cast %124 : vector<1x1x128xf32> to vector<1x128xf32>
    %126 = vector.broadcast %125 : vector<1x128xf32> to vector<12x128xf32>
    %127 = arith.addf %123, %126 : vector<12x128xf32>
    %128 = arith.mulf %127, %127 : vector<12x128xf32>
    %129 = arith.mulf %127, %128 : vector<12x128xf32>
    %cst_70 = arith.constant 4.471500e-02 : f32
    %130 = vector.broadcast %cst_70 : f32 to vector<12x128xf32>
    %131 = arith.mulf %130, %129 : vector<12x128xf32>
    %132 = arith.addf %127, %131 : vector<12x128xf32>
    %cst_71 = arith.constant 0.797884583 : f32
    %133 = vector.broadcast %cst_71 : f32 to vector<12x128xf32>
    %134 = arith.mulf %133, %132 : vector<12x128xf32>
    %135 = math.tanh %134 : vector<12x128xf32>
    %cst_72 = arith.constant 1.000000e+00 : f32
    %136 = vector.broadcast %cst_72 : f32 to vector<12x128xf32>
    %137 = arith.addf %136, %135 : vector<12x128xf32>
    %cst_73 = arith.constant 5.000000e-01 : f32
    %138 = vector.broadcast %cst_73 : f32 to vector<12x128xf32>
    %139 = arith.mulf %138, %137 : vector<12x128xf32>
    %140 = arith.mulf %127, %139 : vector<12x128xf32>
    %c0_74 = arith.constant 0 : index
    %c0_75 = arith.constant 0 : index
    %c0_76 = arith.constant 0 : index
    %141 = vector.load %arg13[%c0_74, %c0_75, %c0_76] : memref<1x128x32xbf16, #tpu.memory_space<vmem>>, vector<1x128x32xbf16>
    %142 = vector.shape_cast %141 : vector<1x128x32xbf16> to vector<128x32xbf16>
    %143 = arith.truncf %140 : vector<12x128xf32> to vector<12x128xbf16>
    %cst_77 = arith.constant dense<0.000000e+00> : vector<12x32xf32>
    %144 = tpu.matmul %143, %142, %cst_77 {dimension_numbers = #tpu.dot_dimension_numbers<[1], [0], [0], [1], [0, 0, 1, 1], [], []>} : vector<12x128xbf16>, vector<128x32xbf16>, vector<12x32xf32> -> vector<12x32xf32>
    %145 = arith.addf %91, %144 : vector<12x32xf32>
    %c0_78 = arith.constant 0 : index
    %c0_79 = arith.constant 0 : index
    %c0_80 = arith.constant 0 : index
    %146 = vector.load %arg14[%c0_78, %c0_79, %c0_80] : memref<1x1x32xf32, #tpu.memory_space<vmem>>, vector<1x1x32xf32>
    %147 = vector.shape_cast %146 : vector<1x1x32xf32> to vector<1x32xf32>
    %148 = vector.broadcast %147 : vector<1x32xf32> to vector<12x32xf32>
    %149 = arith.addf %145, %148 : vector<12x32xf32>
    %c1_i32 = arith.constant 1 : i32
    %150 = arith.cmpi slt, %arg1, %c1_i32 : i32
    %151 = arith.extui %150 : i1 to i32
    %c0_i32_81 = arith.constant 0 : i32
    %152 = arith.cmpi ne, %151, %c0_i32_81 : i32
    scf.if %152 {
      %c0_84 = arith.constant 0 : index
      %c0_85 = arith.constant 0 : index
      %c0_86 = arith.constant 0 : index
      %156 = vector.load %arg17[%c0_84, %c0_85, %c0_86] : memref<1x12x32xf32, #tpu.memory_space<vmem>>, vector<1x12x32xf32>
      %157 = vector.shape_cast %156 : vector<1x12x32xf32> to vector<12x32xf32>
      %158 = vector.shape_cast %149 : vector<12x32xf32> to vector<1x12x32xf32>
      tpu.vector_store %arg17[%c0_84, %c0_85, %c0_86], %158 {strides = array<i32>} : memref<1x12x32xf32, #tpu.memory_space<vmem>>, vector<1x12x32xf32>,
    } else {
    }
    %c1_i32_82 = arith.constant 1 : i32
    %153 = arith.cmpi eq, %arg1, %c1_i32_82 : i32
    %154 = arith.extui %153 : i1 to i32
    %c0_i32_83 = arith.constant 0 : i32
    %155 = arith.cmpi ne, %154, %c0_i32_83 : i32
    scf.if %155 {
      %c0_84 = arith.constant 0 : index
      %c0_85 = arith.constant 0 : index
      %156 = vector.load %arg15[%c0_84, %c0_85] : memref<1x32xf32, #tpu.memory_space<vmem>>, vector<1x32xf32>
      %c0_86 = arith.constant 0 : index
      %c0_87 = arith.constant 0 : index
      %157 = vector.load %arg16[%c0_86, %c0_87] : memref<1x32xf32, #tpu.memory_space<vmem>>, vector<1x32xf32>
      %cst_88 = arith.constant dense<0.000000e+00> : vector<12xf32>
      %158 = vector.multi_reduction <add>, %149, %cst_88 [1] : vector<12x32xf32> to vector<12xf32>
      %159 = vector.shape_cast %158 : vector<12xf32> to vector<12x1xf32>
      %cst_89 = arith.constant 3.200000e+01 : f32
      %160 = vector.broadcast %cst_89 : f32 to vector<12x1xf32>
      %161 = arith.divf %159, %160 : vector<12x1xf32>
      %162 = vector.broadcast %161 : vector<12x1xf32> to vector<12x32xf32>
      %163 = arith.subf %149, %162 : vector<12x32xf32>
      %164 = vector.broadcast %161 : vector<12x1xf32> to vector<12x32xf32>
      %165 = arith.subf %149, %164 : vector<12x32xf32>
      %166 = arith.mulf %163, %165 : vector<12x32xf32>
      %cst_90 = arith.constant dense<0.000000e+00> : vector<12xf32>
      %167 = vector.multi_reduction <add>, %166, %cst_90 [1] : vector<12x32xf32> to vector<12xf32>
      %168 = vector.shape_cast %167 : vector<12xf32> to vector<12x1xf32>
      %cst_91 = arith.constant 3.200000e+01 : f32
      %169 = vector.broadcast %cst_91 : f32 to vector<12x1xf32>
      %170 = arith.divf %168, %169 : vector<12x1xf32>
      %171 = vector.broadcast %161 : vector<12x1xf32> to vector<12x32xf32>
      %172 = arith.subf %149, %171 : vector<12x32xf32>
      %cst_92 = arith.constant 9.99999974E-6 : f32
      %173 = vector.broadcast %cst_92 : f32 to vector<12x1xf32>
      %174 = arith.addf %170, %173 : vector<12x1xf32>
      %175 = math.rsqrt %174 : vector<12x1xf32>
      %176 = vector.broadcast %175 : vector<12x1xf32> to vector<12x32xf32>
      %177 = arith.mulf %172, %176 : vector<12x32xf32>
      %178 = vector.broadcast %156 : vector<1x32xf32> to vector<12x32xf32>
      %179 = arith.mulf %177, %178 : vector<12x32xf32>
      %180 = vector.broadcast %157 : vector<1x32xf32> to vector<12x32xf32>
      %181 = arith.addf %179, %180 : vector<12x32xf32>
      %c0_93 = arith.constant 0 : index
      %c0_94 = arith.constant 0 : index
      %c0_95 = arith.constant 0 : index
      %182 = vector.load %arg17[%c0_93, %c0_94, %c0_95] : memref<1x12x32xf32, #tpu.memory_space<vmem>>, vector<1x12x32xf32>
      %183 = vector.shape_cast %182 : vector<1x12x32xf32> to vector<12x32xf32>
      %184 = vector.shape_cast %181 : vector<12x32xf32> to vector<1x12x32xf32>
      tpu.vector_store %arg17[%c0_93, %c0_94, %c0_95], %184 {strides = array<i32>} : memref<1x12x32xf32, #tpu.memory_space<vmem>>, vector<1x12x32xf32>,
    } else {
    }
    return
  }
  func.func @transform_0(%arg0: i32, %arg1: i32) -> (i32, i32, i32) {
    %c0_i32 = arith.constant 0 : i32
    %c0_i32_0 = arith.constant 0 : i32
    %c0_i32_1 = arith.constant 0 : i32
    return %arg0, %c0_i32, %c0_i32_0 : i32, i32, i32
  }
  func.func @transform_1(%arg0: i32, %arg1: i32) -> (i32, i32, i32) {
    %c0_i32 = arith.constant 0 : i32
    %c0_i32_0 = arith.constant 0 : i32
    %c0_i32_1 = arith.constant 0 : i32
    return %arg1, %c0_i32, %c0_i32_0 : i32, i32, i32
  }
  func.func @transform_2(%arg0: i32, %arg1: i32) -> (i32, i32, i32) {
    %c0_i32 = arith.constant 0 : i32
    %c0_i32_0 = arith.constant 0 : i32
    %c0_i32_1 = arith.constant 0 : i32
    return %arg1, %c0_i32, %c0_i32_0 : i32, i32, i32
  }
  func.func @transform_3(%arg0: i32, %arg1: i32) -> (i32, i32, i32) {
    %c0_i32 = arith.constant 0 : i32
    %c0_i32_0 = arith.constant 0 : i32
    %c0_i32_1 = arith.constant 0 : i32
    return %arg1, %c0_i32, %c0_i32_0 : i32, i32, i32
  }
  func.func @transform_4(%arg0: i32, %arg1: i32) -> (i32, i32, i32) {
    %c0_i32 = arith.constant 0 : i32
    %c0_i32_0 = arith.constant 0 : i32
    %c0_i32_1 = arith.constant 0 : i32
    return %arg1, %c0_i32, %c0_i32_0 : i32, i32, i32
  }
  func.func @transform_5(%arg0: i32, %arg1: i32) -> (i32, i32, i32) {
    %c0_i32 = arith.constant 0 : i32
    %c0_i32_0 = arith.constant 0 : i32
    %c0_i32_1 = arith.constant 0 : i32
    return %arg1, %c0_i32, %c0_i32_0 : i32, i32, i32
  }
  func.func @transform_6(%arg0: i32, %arg1: i32) -> (i32, i32, i32) {
    %c0_i32 = arith.constant 0 : i32
    %c0_i32_0 = arith.constant 0 : i32
    %c0_i32_1 = arith.constant 0 : i32
    return %arg1, %c0_i32, %c0_i32_0 : i32, i32, i32
  }
  func.func @transform_7(%arg0: i32, %arg1: i32) -> (i32, i32, i32) {
    %c0_i32 = arith.constant 0 : i32
    %c0_i32_0 = arith.constant 0 : i32
    %c0_i32_1 = arith.constant 0 : i32
    return %arg1, %c0_i32, %c0_i32_0 : i32, i32, i32
  }
  func.func @transform_8(%arg0: i32, %arg1: i32) -> (i32, i32, i32) {
    %c0_i32 = arith.constant 0 : i32
    %c0_i32_0 = arith.constant 0 : i32
    %c0_i32_1 = arith.constant 0 : i32
    return %arg1, %c0_i32, %c0_i32_0 : i32, i32, i32
  }
  func.func @transform_9(%arg0: i32, %arg1: i32) -> (i32, i32, i32) {
    %c0_i32 = arith.constant 0 : i32
    %c0_i32_0 = arith.constant 0 : i32
    %c0_i32_1 = arith.constant 0 : i32
    return %arg1, %c0_i32, %c0_i32_0 : i32, i32, i32
  }
  func.func @transform_10(%arg0: i32, %arg1: i32) -> (i32, i32, i32) {
    %c0_i32 = arith.constant 0 : i32
    %c0_i32_0 = arith.constant 0 : i32
    %c0_i32_1 = arith.constant 0 : i32
    return %arg1, %c0_i32, %c0_i32_0 : i32, i32, i32
  }
  func.func @transform_11(%arg0: i32, %arg1: i32) -> (i32, i32, i32) {
    %c0_i32 = arith.constant 0 : i32
    %c0_i32_0 = arith.constant 0 : i32
    %c0_i32_1 = arith.constant 0 : i32
    return %arg1, %c0_i32, %c0_i32_0 : i32, i32, i32
  }
  func.func @transform_12(%arg0: i32, %arg1: i32) -> (i32, i32, i32) {
    %c0_i32 = arith.constant 0 : i32
    %c0_i32_0 = arith.constant 0 : i32
    %c0_i32_1 = arith.constant 0 : i32
    return %arg1, %c0_i32, %c0_i32_0 : i32, i32, i32
  }
  func.func @transform_13(%arg0: i32, %arg1: i32) -> (i32, i32) {
    %c0_i32 = arith.constant 0 : i32
    %c0_i32_0 = arith.constant 0 : i32
    %c0_i32_1 = arith.constant 0 : i32
    return %c0_i32, %c0_i32_0 : i32, i32
  }
  func.func @transform_14(%arg0: i32, %arg1: i32) -> (i32, i32) {
    %c0_i32 = arith.constant 0 : i32
    %c0_i32_0 = arith.constant 0 : i32
    %c0_i32_1 = arith.constant 0 : i32
    return %c0_i32, %c0_i32_0 : i32, i32
  }
  func.func @transform_15(%arg0: i32, %arg1: i32) -> (i32, i32, i32) {
    %c0_i32 = arith.constant 0 : i32
    %c0_i32_0 = arith.constant 0 : i32
    %c0_i32_1 = arith.constant 0 : i32
    return %arg0, %c0_i32, %c0_i32_0 : i32, i32, i32
  }
}

module attributes {stable_mosaic.version = 11 : i64} {
  func.func @_project_mse_kernel(%arg0: i32, %arg1: memref<16x32xf32, #tpu.memory_space<vmem>>, %arg2: memref<32x32xbf16, #tpu.memory_space<vmem>>, %arg3: memref<1x32xf32, #tpu.memory_space<vmem>>, %arg4: memref<16x32xf32, #tpu.memory_space<vmem>>, %arg5: memref<16x32xf32, #tpu.memory_space<vmem>>, %arg6: memref<1x1xf32, #tpu.memory_space<vmem>>) attributes {dimension_semantics = [#tpu.dimension_semantics<arbitrary>], iteration_bounds = array<i64: 1>, scalar_prefetch = 0 : i64, scratch_operands = 0 : i64, tpu.core_type = #tpu.core_type<tc>, window_params = [{pipeline_mode = #tpu.pipeline_mode<synchronous>, transform_indices = @transform_0, window_bounds = array<i64: 16, 32>}, {pipeline_mode = #tpu.pipeline_mode<synchronous>, transform_indices = @transform_1, window_bounds = array<i64: 32, 32>}, {pipeline_mode = #tpu.pipeline_mode<synchronous>, transform_indices = @transform_2, window_bounds = array<i64: 1, 32>}, {pipeline_mode = #tpu.pipeline_mode<synchronous>, transform_indices = @transform_3, window_bounds = array<i64: 16, 32>}, {pipeline_mode = #tpu.pipeline_mode<synchronous>, transform_indices = @transform_4, window_bounds = array<i64: 16, 32>}, {pipeline_mode = #tpu.pipeline_mode<synchronous>, transform_indices = @transform_5, window_bounds = array<i64: 1, 1>}]} {
    %c0 = arith.constant 0 : index
    %c0_0 = arith.constant 0 : index
    %0 = vector.load %arg1[%c0, %c0_0] : memref<16x32xf32, #tpu.memory_space<vmem>>, vector<16x32xf32>
    %c0_1 = arith.constant 0 : index
    %c0_2 = arith.constant 0 : index
    %1 = vector.load %arg2[%c0_1, %c0_2] : memref<32x32xbf16, #tpu.memory_space<vmem>>, vector<32x32xbf16>
    %2 = arith.truncf %0 : vector<16x32xf32> to vector<16x32xbf16>
    %cst = arith.constant dense<0.000000e+00> : vector<16x32xf32>
    %3 = tpu.matmul %2, %1, %cst {dimension_numbers = #tpu.dot_dimension_numbers<[1], [0], [0], [1], [0, 0, 1, 1], [], []>} : vector<16x32xbf16>, vector<32x32xbf16>, vector<16x32xf32> -> vector<16x32xf32>
    %c0_3 = arith.constant 0 : index
    %c0_4 = arith.constant 0 : index
    %4 = vector.load %arg3[%c0_3, %c0_4] : memref<1x32xf32, #tpu.memory_space<vmem>>, vector<1x32xf32>
    %5 = vector.broadcast %4 : vector<1x32xf32> to vector<16x32xf32>
    %6 = arith.addf %3, %5 : vector<16x32xf32>
    %c0_5 = arith.constant 0 : index
    %c0_6 = arith.constant 0 : index
    %7 = vector.load %arg5[%c0_5, %c0_6] : memref<16x32xf32, #tpu.memory_space<vmem>>, vector<16x32xf32>
    tpu.vector_store %arg5[%c0_5, %c0_6], %6 {strides = array<i32>} : memref<16x32xf32, #tpu.memory_space<vmem>>, vector<16x32xf32>,
    %c0_7 = arith.constant 0 : index
    %c0_8 = arith.constant 0 : index
    %8 = vector.load %arg4[%c0_7, %c0_8] : memref<16x32xf32, #tpu.memory_space<vmem>>, vector<16x32xf32>
    %9 = arith.subf %6, %8 : vector<16x32xf32>
    %10 = arith.mulf %9, %9 : vector<16x32xf32>
    %11 = vector.shape_cast %10 : vector<16x32xf32> to vector<1x16x32xf32>
    %cst_9 = arith.constant dense<0.000000e+00> : vector<1xf32>
    %12 = vector.multi_reduction <add>, %11, %cst_9 [1, 2] : vector<1x16x32xf32> to vector<1xf32>
    %13 = vector.shape_cast %12 : vector<1xf32> to vector<1x1x1xf32>
    %14 = vector.extract %13[0, 0, 0] : f32 from vector<1x1x1xf32>
    %15 = vector.broadcast %14 : f32 to vector<1x1xf32>
    %cst_10 = arith.constant 0.001953125 : f32
    %16 = vector.broadcast %cst_10 : f32 to vector<1x1xf32>
    %17 = arith.mulf %15, %16 : vector<1x1xf32>
    %c0_11 = arith.constant 0 : index
    %c0_12 = arith.constant 0 : index
    %18 = vector.load %arg6[%c0_11, %c0_12] : memref<1x1xf32, #tpu.memory_space<vmem>>, vector<1x1xf32>
    tpu.vector_store %arg6[%c0_11, %c0_12], %17 {strides = array<i32>} : memref<1x1xf32, #tpu.memory_space<vmem>>, vector<1x1xf32>,
    return
  }
  func.func @transform_0(%arg0: i32) -> (i32, i32) {
    %c0_i32 = arith.constant 0 : i32
    %c0_i32_0 = arith.constant 0 : i32
    %c0_i32_1 = arith.constant 0 : i32
    return %c0_i32, %c0_i32_0 : i32, i32
  }
  func.func @transform_1(%arg0: i32) -> (i32, i32) {
    %c0_i32 = arith.constant 0 : i32
    %c0_i32_0 = arith.constant 0 : i32
    %c0_i32_1 = arith.constant 0 : i32
    return %c0_i32, %c0_i32_0 : i32, i32
  }
  func.func @transform_2(%arg0: i32) -> (i32, i32) {
    %c0_i32 = arith.constant 0 : i32
    %c0_i32_0 = arith.constant 0 : i32
    %c0_i32_1 = arith.constant 0 : i32
    return %c0_i32, %c0_i32_0 : i32, i32
  }
  func.func @transform_3(%arg0: i32) -> (i32, i32) {
    %c0_i32 = arith.constant 0 : i32
    %c0_i32_0 = arith.constant 0 : i32
    %c0_i32_1 = arith.constant 0 : i32
    return %c0_i32, %c0_i32_0 : i32, i32
  }
  func.func @transform_4(%arg0: i32) -> (i32, i32) {
    %c0_i32 = arith.constant 0 : i32
    %c0_i32_0 = arith.constant 0 : i32
    %c0_i32_1 = arith.constant 0 : i32
    return %c0_i32, %c0_i32_0 : i32, i32
  }
  func.func @transform_5(%arg0: i32) -> (i32, i32) {
    %c0_i32 = arith.constant 0 : i32
    %c0_i32_0 = arith.constant 0 : i32
    %c0_i32_1 = arith.constant 0 : i32
    return %c0_i32, %c0_i32_0 : i32, i32
  }
}

module attributes {stable_mosaic.version = 11 : i64} {
  func.func @_vq_kernel(%arg0: i32, %arg1: memref<8x32xf32, #tpu.memory_space<vmem>>, %arg2: memref<16x32xf32, #tpu.memory_space<vmem>>, %arg3: memref<8x32xf32, #tpu.memory_space<vmem>>, %arg4: memref<8x1xi32, #tpu.memory_space<vmem>>) attributes {dimension_semantics = [#tpu.dimension_semantics<arbitrary>], iteration_bounds = array<i64: 1>, scalar_prefetch = 0 : i64, scratch_operands = 0 : i64, tpu.core_type = #tpu.core_type<tc>, window_params = [{pipeline_mode = #tpu.pipeline_mode<synchronous>, transform_indices = @transform_0, window_bounds = array<i64: 8, 32>}, {pipeline_mode = #tpu.pipeline_mode<synchronous>, transform_indices = @transform_1, window_bounds = array<i64: 16, 32>}, {pipeline_mode = #tpu.pipeline_mode<synchronous>, transform_indices = @transform_2, window_bounds = array<i64: 8, 32>}, {pipeline_mode = #tpu.pipeline_mode<synchronous>, transform_indices = @transform_3, window_bounds = array<i64: 8, 1>}]} {
    %c0 = arith.constant 0 : index
    %c0_0 = arith.constant 0 : index
    %0 = vector.load %arg1[%c0, %c0_0] : memref<8x32xf32, #tpu.memory_space<vmem>>, vector<8x32xf32>
    %c0_1 = arith.constant 0 : index
    %c0_2 = arith.constant 0 : index
    %1 = vector.load %arg2[%c0_1, %c0_2] : memref<16x32xf32, #tpu.memory_space<vmem>>, vector<16x32xf32>
    %2 = arith.mulf %0, %0 : vector<8x32xf32>
    %cst = arith.constant dense<0.000000e+00> : vector<8xf32>
    %3 = vector.multi_reduction <add>, %2, %cst [1] : vector<8x32xf32> to vector<8xf32>
    %4 = vector.shape_cast %3 : vector<8xf32> to vector<8x1xf32>
    %5 = arith.mulf %1, %1 : vector<16x32xf32>
    %cst_3 = arith.constant dense<0.000000e+00> : vector<16xf32>
    %6 = vector.multi_reduction <add>, %5, %cst_3 [1] : vector<16x32xf32> to vector<16xf32>
    %7 = vector.shape_cast %6 : vector<16xf32> to vector<1x16xf32>
    %8 = arith.truncf %0 : vector<8x32xf32> to vector<8x32xbf16>
    %9 = arith.truncf %1 : vector<16x32xf32> to vector<16x32xbf16>
    %cst_4 = arith.constant dense<0.000000e+00> : vector<8x16xf32>
    %10 = tpu.matmul %8, %9, %cst_4 {dimension_numbers = #tpu.dot_dimension_numbers<[1], [1], [0], [0], [0, 0, 1, 0], [], []>} : vector<8x32xbf16>, vector<16x32xbf16>, vector<8x16xf32> -> vector<8x16xf32>
    %cst_5 = arith.constant 2.000000e+00 : f32
    %11 = vector.broadcast %cst_5 : f32 to vector<8x16xf32>
    %12 = arith.mulf %11, %10 : vector<8x16xf32>
    %13 = vector.broadcast %4 : vector<8x1xf32> to vector<8x16xf32>
    %14 = arith.subf %13, %12 : vector<8x16xf32>
    %15 = vector.broadcast %7 : vector<1x16xf32> to vector<8x16xf32>
    %16 = arith.addf %14, %15 : vector<8x16xf32>
    %cst_6 = arith.constant dense<0x7F800000> : vector<8xf32>
    %17 = vector.multi_reduction <minimumf>, %16, %cst_6 [1] : vector<8x16xf32> to vector<8xf32>
    %18 = vector.shape_cast %17 : vector<8xf32> to vector<8x1xf32>
    %19 = tpu.iota {dimensions = array<i32: 1>} : vector<8x16xi32>
    %20 = vector.broadcast %18 : vector<8x1xf32> to vector<8x16xf32>
    %21 = arith.cmpf ole, %16, %20 : vector<8x16xf32>
    %c16_i32 = arith.constant 16 : i32
    %22 = vector.broadcast %c16_i32 : i32 to vector<8x16xi32>
    %23 = arith.select %21, %19, %22 : vector<8x16xi1>, vector<8x16xi32>
    %cst_7 = arith.constant dense<2147483647> : vector<8xi32>
    %24 = vector.multi_reduction <minsi>, %23, %cst_7 [1] : vector<8x16xi32> to vector<8xi32>
    %25 = vector.shape_cast %24 : vector<8xi32> to vector<8x1xi32>
    %c0_8 = arith.constant 0 : index
    %c0_9 = arith.constant 0 : index
    %26 = vector.load %arg4[%c0_8, %c0_9] : memref<8x1xi32, #tpu.memory_space<vmem>>, vector<8x1xi32>
    tpu.vector_store %arg4[%c0_8, %c0_9], %25 {strides = array<i32>} : memref<8x1xi32, #tpu.memory_space<vmem>>, vector<8x1xi32>,
    %27 = vector.broadcast %25 : vector<8x1xi32> to vector<8x16xi32>
    %28 = arith.cmpi eq, %19, %27 : vector<8x16xi32>
    %29 = arith.extui %28 : vector<8x16xi1> to vector<8x16xi32>
    %30 = arith.sitofp %29 : vector<8x16xi32> to vector<8x16xf32>
    %31 = arith.truncf %30 : vector<8x16xf32> to vector<8x16xbf16>
    %32 = arith.truncf %1 : vector<16x32xf32> to vector<16x32xbf16>
    %cst_10 = arith.constant dense<0.000000e+00> : vector<8x32xf32>
    %33 = tpu.matmul %31, %32, %cst_10 {dimension_numbers = #tpu.dot_dimension_numbers<[1], [0], [0], [1], [0, 0, 1, 1], [], []>} : vector<8x16xbf16>, vector<16x32xbf16>, vector<8x32xf32> -> vector<8x32xf32>
    %c0_11 = arith.constant 0 : index
    %c0_12 = arith.constant 0 : index
    %34 = vector.load %arg3[%c0_11, %c0_12] : memref<8x32xf32, #tpu.memory_space<vmem>>, vector<8x32xf32>
    tpu.vector_store %arg3[%c0_11, %c0_12], %33 {strides = array<i32>} : memref<8x32xf32, #tpu.memory_space<vmem>>, vector<8x32xf32>,
    return
  }
  func.func @transform_0(%arg0: i32) -> (i32, i32) {
    %c0_i32 = arith.constant 0 : i32
    %c0_i32_0 = arith.constant 0 : i32
    %c0_i32_1 = arith.constant 0 : i32
    return %c0_i32, %c0_i32_0 : i32, i32
  }
  func.func @transform_1(%arg0: i32) -> (i32, i32) {
    %c0_i32 = arith.constant 0 : i32
    %c0_i32_0 = arith.constant 0 : i32
    %c0_i32_1 = arith.constant 0 : i32
    return %c0_i32, %c0_i32_0 : i32, i32
  }
  func.func @transform_2(%arg0: i32) -> (i32, i32) {
    %c0_i32 = arith.constant 0 : i32
    %c0_i32_0 = arith.constant 0 : i32
    %c0_i32_1 = arith.constant 0 : i32
    return %c0_i32, %c0_i32_0 : i32, i32
  }
  func.func @transform_3(%arg0: i32) -> (i32, i32) {
    %c0_i32 = arith.constant 0 : i32
    %c0_i32_0 = arith.constant 0 : i32
    %c0_i32_1 = arith.constant 0 : i32
    return %c0_i32, %c0_i32_0 : i32, i32
  }
}

</mosaic_0001>

<bundles_post_ra>
// kernel: tokenizer_forward.5
= control target key start
LH: loop header
LB: loop body
LE: loop exit
PB: predicated region body
PF: predicated region fallthrough
CT: control target
= control target key end

     0   :  { %v118_v0 = vmov 0.0   ;;  %vm119_vm0 = vmmov 0   ;;  %vm44_vm1 = vcmask 261120   ;;  %s175_s1 = inlined_call_operand.vmem [shape: bf16[32,32], index: 1, kind: input, shape index: {}]   ;;  %s176_s0 = inlined_call_operand.vmem [shape: f32[16,32], index: 0, kind: input, shape index: {}]   ;;  %s177_s2 = inlined_call_operand.vmem [shape: f32[1,32], index: 2, kind: input, shape index: {}]   ;;  %s178_s3 = inlined_call_operand.vmem [shape: f32[16,32], index: 3, kind: input, shape index: {}]   ;;  %s179_s4 = inlined_call_operand.vmem [shape: f32[16,32], index: 4, kind: output, shape index: {}]  }
   0x1   :  { %106 = vmatprep.subr.bf16.mxu0 %v118_v0  ;;  %v116_v1 = vld [vmem:[%s175_s1] sm:$0xff]   ;;  %110 = vmatprep.mubr.msk.bf16.mxu0 %vm119_vm0, %v118_v0  ;;  %v117_v2 = vld [vmem:[%s175_s1 + $0x8] sm:$0xff]  }
   0x2   :  { %107 = vmatpush3.bf16.msra.mxu0 %v116_v1  ;;  %v18_v3 = vld [vmem:[%s176_s0] sm:$0xff]  ;;  %v19_v4 = vld [vmem:[%s176_s0 + $0x8] sm:$0xff] }
   0x3   :  { %108 = vmatprep.subr.bf16.mxu0 %v118_v0  ;;  %v24_v5 = vpack.c.bf16 %v19_v4, %v18_v3  ;;  %v99_v6 = vld [vmem:[%s177_s2] ss:$0 sm:$0xff]  ;;  %v90_v12 = vld [vmem:[%s178_s3 + $0x8] sm:$0xff] }
   0x4   :  { %v89_v8 = vld [vmem:[%s178_s3] sm:$0xff] }
   0x6   :  { %109 = vmatpush3.bf16.msra.mxu0 %v117_v2 }
   0x9   :  { %111 = vmatmul.mubr.msk.bf16.vlgmr.msra.gmra.mrb[0].mxu0 %vm44_vm1, %v24_v5 }
  0xdc   :  { %v82_v7 = vpop.f32.mrb[0].mxu0 }
  0xdd   :  { %v83_v9 = vadd.f32 %v99_v6, %v82_v7  ;;  %v112_v10 = vpop.f32.mrb[1].mxu0 }
  0xde   :  { %v85_v11 = vpop.f32.mrb[2].mxu0 }
  0xdf   :  { %v91_v13 = vadd.f32 %v89_v8, %v83_v9  ;;  %v86_v14 = vadd.f32 %v99_v6, %v85_v11  ;;  %v113_v15 = vpop.f32.mrb[3].mxu0 }
  0xe1   :  { %93 = vst.msk [vmem:[%s179_s4] sm:$0xff] %vm44_vm1, %v91_v13  ;;  %v92_v16 = vadd.f32 %v90_v12, %v86_v14 }
  0xe3   :  { %94 = vst.msk [vmem:[%s179_s4 + $0x8] sm:$0xff] %vm44_vm1, %v92_v16 }

// kernel: tokenizer_forward.9
= control target key start
LH: loop header
LB: loop body
LE: loop exit
PB: predicated region body
PF: predicated region fallthrough
CT: control target
= control target key end

     0   :  { %v180_v1 = vmov 0.0   ;;  %vm181_vm0 = vmmov 0   ;;  %s257_s0 = inlined_call_operand.vmem [shape: f32[16,32], index: 0, kind: input, shape index: {}]   ;;  %s258_s1 = inlined_call_operand.vmem [shape: bf16[32,32], index: 1, kind: input, shape index: {}]   ;;  %s259_s2 = inlined_call_operand.vmem [shape: f32[1,32], index: 2, kind: input, shape index: {}]   ;;  %s260_s3 = inlined_call_operand.vmem [shape: f32[16,32], index: 3, kind: input, shape index: {}]   ;;  %s261_s4 = inlined_call_operand.vmem [shape: f32[16,32], index: 4, kind: output, shape index: {0}]   ;;  %s262_s5 = inlined_call_operand.hbm [shape: f32[1,1], index: 5, kind: output, shape index: {1}]  }
   0x1   :  { %v154_v0 = vld [vmem:[%s258_s1] sm:$0xff]   ;;  %141 = vmatprep.subr.bf16.mxu0 %v180_v1  ;;  %v155_v2 = vld [vmem:[%s258_s1 + $0x8] sm:$0xff]   ;;  %145 = vmatprep.mubr.msk.bf16.mxu0 %vm181_vm0, %v180_v1 }
   0x2   :  { %142 = vmatpush3.bf16.msra.mxu0 %v154_v0  ;;  %v21_v3 = vld [vmem:[%s257_s0] sm:$0xff]  ;;  %v22_v4 = vld [vmem:[%s257_s0 + $0x8] sm:$0xff] }
   0x3   :  { %143 = vmatprep.subr.bf16.mxu0 %v180_v1 }
   0x4   :  { %11 = vsyncpa [#allocation3], 0  ;;  %v27_v5 = vpack.c.bf16 %v22_v4, %v21_v3  ;;  %vm47_vm1 = vcmask 261120   ;;  %v134_v6 = vld [vmem:[%s259_s2] ss:$0 sm:$0xff]  ;;  %v95_v12 = vld [vmem:[%s260_s3 + $0x8] sm:$0xff] }
   0x5   :  { %v94_v8 = vld [vmem:[%s260_s3] sm:$0xff]  ;;  %s182_s3 = smov [#allocation2]   ;;  %vm114_vm2 = vcmask 0  }
   0x6   :  { %144 = vmatpush3.bf16.msra.mxu0 %v155_v2  ;;  %s124_s8 = sshll.u32 %s182_s3, 4  ;;  %s125_s8 = int_to_ptr.vmem [resolvable:$true] %s124_s8 }
   0x7   :  { %s156_s9 = scalar_lea.vmem %s125_s8, 16  ;;  %s160_s10 = scalar_lea.vmem %s125_s8, 32 }
   0x8   :  { %p157_p0 = scmp.ne.s32.totalorder %s125_s8, %s156_s9  ;;  %p161_p1 = scmp.lt.s32.totalorder %s125_s8, %s125_s8 }
   0x9   :  { %146 = vmatmul.mubr.msk.bf16.vlgmr.msra.gmra.mrb[0].mxu0 %vm47_vm1, %v27_v5  ;;  %p162_p2 = scmp.lt.s32.totalorder %s160_s10, %s156_s9 }
   0xb   :  { %p163_p3 = por %p162_p2, %p161_p1 }
   0xd   :  { %p164_p4 = pnand %p163_p3, %p157_p0 }
  0xdc   :  { %v85_v7 = vpop.f32.mrb[0].mxu0 }
  0xdd   :  { %v86_v9 = vadd.f32 %v134_v6, %v85_v7  ;;  %v147_v10 = vpop.f32.mrb[1].mxu0 }
  0xde   :  { %v88_v11 = vpop.f32.mrb[2].mxu0 }
  0xdf   :  { %92 = vst.msk [vmem:[%s261_s4] sm:$0xff] %vm47_vm1, %v86_v9  ;;  %v96_v13 = vsub.f32 %v86_v9, %v94_v8  ;;  %v89_v14 = vadd.f32 %v134_v6, %v88_v11  ;;  %v148_v15 = vpop.f32.mrb[3].mxu0 }
  0xe1   :  { %93 = vst.msk [vmem:[%s261_s4 + $0x8] sm:$0xff] %vm47_vm1, %v89_v14  ;;  %v97_v16 = vsub.f32 %v89_v14, %v95_v12  ;;  %v98_v17 = vmul.f32 %v96_v13, %v96_v13 }
  0xe3   :  { %v99_v18 = vmul.f32 %v97_v16, %v97_v16  ;;  %v100_v19 = vsel %vm47_vm1, %v98_v17, 0.0 }
  0xe5   :  { %v101_v20 = vsel %vm47_vm1, %v99_v18, 0.0 }
  0xe6   :  { %v102_v21 = vadd.f32 %v101_v20, %v100_v19 }
  0xe8   :  { %103 = vadd.xlane.f32.xlu0 %v102_v21 }
 0x175   :  { %v104_v22 = vpop.xlane.xlu0 %103 }
 0x176   :  { %v105_v23 = vrot.slane %v104_v22, 4 }
 0x178   :  { %v106_v24 = vadd.f32 %v105_v23, %v104_v22 }
 0x17a   :  { %v107_v25 = vrot.slane %v106_v24, 2 }
 0x17c   :  { %v108_v26 = vadd.f32 %v107_v25, %v106_v24 }
 0x17e   :  { %v109_v27 = vrot.slane %v108_v26, 1 }
 0x180   :  { %v110_v28 = vadd.f32 %v109_v27, %v108_v26 }
 0x182   :  { %149 = vpush %v110_v28 }
 0x1b3   :  { %s150_s4 = spop %149 }
 0x1b4   :  { %v112_v29 = vstv %s150_s4 }
 0x1b5   :  { %v113_v30 = vmul.f32 0.001953125, %v112_v29 }
 0x1b7   :  { %115 = vst.msk [vmem:[#allocation2] sm:$0x1] %vm114_vm2, %v113_v30 }
 0x1b8   :  { %167 = shalt.err (!%p164_p4)
}
 0x1b9   :  { %s168_s13 = scalar_lea.hbm %s262_s5, 16 }
 0x1ba   :  { %p169_p5 = scmp.ne.s32.totalorder %s262_s5, %s168_s13  ;;  %p172_p6 = scmp.lt.u32.totalorder %s168_s13, %s262_s5 }
 0x1bc   :  { %p174_p7 = pnand %p172_p6, %p169_p5 }
 0x1be   :  { %177 = shalt.err (!%p174_p7)
}
 0x1bf   :  { %127 = dma.vmem_to_hbm [thread:$0]  %s125_s8, 16, %s262_s5, [#allocation3]  }
 0x1c0   :  { %178 = dma.done.wait [#allocation3], 16  }
 0x1c1   :  { %179 = vsyncadd [#allocation3], 4294967280 }
 0x1c2   :  { %133 = vsyncpa [#allocation3], 1 }

// kernel: squeeze.2
= control target key start
LH: loop header
LB: loop body
LE: loop exit
PB: predicated region body
PF: predicated region fallthrough
CT: control target
= control target key end

     0   :  { %s85_s0 = inlined_call_operand.vmem [shape: s32[8], index: 0, kind: input, shape index: {}]   ;;  %s86_s1 = inlined_call_operand.hbm [shape: s32[2,4], index: 1, kind: output, shape index: {}]  }
   0x1   :  { %v5_v0 = vld [vmem:[%s85_s0] sm:$0x1] }
   0x2   :  { %2 = vsyncpa [#allocation1], 0  ;;  %6 = vst [vmem:[#allocation3] sm:$0x1] %v5_v0  ;;  %vm8_vm0 = vcmask 31744   ;;  %s58_s0 = smov 124  }
   0x3   :  { %s59_s8 = smov [#allocation0]  }
   0x4   :  { %s26_s9 = sshll.u32 %s59_s8, 4  ;;  %s27_s9 = int_to_ptr.vmem [resolvable:$true] %s26_s9 }
   0x5   :  { %s34_s10 = scalar_lea.vmem %s27_s9, 32  ;;  %p39_p1 = scmp.lt.s32.totalorder %s27_s9, %s27_s9 }
   0x6   :  { %p35_p0 = scmp.ne.s32.totalorder %s27_s9, %s34_s10  ;;  %p40_p2 = scmp.lt.s32.totalorder %s34_s10, %s34_s10 }
   0x8   :  { %p41_p3 = por %p40_p2, %p39_p1 }
   0x9   :  { %v10_v1 = vld [vmem:[#allocation3] sm:$0x1]  }
   0xa   :  { %v7_v2 = vld [vmem:[#allocation3] sm:$0x1]   ;;  %11 = vrot.lane.b32.xlu0 %v10_v1, %s58_s0  ;;  %p42_p4 = pnand %p41_p3, %p35_p0 }
   0xb   :  { %9 = vst.msk [vmem:[#allocation2] sm:$0x1] %vm8_vm0, %v7_v2  }
  0x7c   :  { %v12_v3 = vpop.permute.xlu0 %11  }
  0x7d   :  { %15 = vst.msk [vmem:[#allocation2 + $0x1] sm:$0x1] %vm8_vm0, %v12_v3  }
  0x84   :  { %v19_v4 = vld [vmem:[#allocation2] sm:$0x3] }
  0x85   :  { %21 = vst [vmem:[#allocation0] sm:$0x3] %v19_v4 }
  0x86   :  { %45 = shalt.err (!%p42_p4)
}
  0x87   :  { %s46_s13 = scalar_lea.hbm %s86_s1, 32 }
  0x88   :  { %p47_p5 = scmp.ne.s32.totalorder %s86_s1, %s46_s13  ;;  %p50_p6 = scmp.lt.u32.totalorder %s46_s13, %s86_s1 }
  0x8a   :  { %p52_p7 = pnand %p50_p6, %p47_p5 }
  0x8c   :  { %55 = shalt.err (!%p52_p7)
}
  0x8d   :  { %29 = dma.vmem_to_hbm [thread:$0]  %s27_s9, 32, %s86_s1, [#allocation1]  }
  0x8e   :  { %56 = dma.done.wait [#allocation1], 32  }
  0x8f   :  { %57 = vsyncadd [#allocation1], 4294967264 }
  0x90   :  { %31 = vsyncpa [#allocation1], 1 }

// kernel: tokenizer_forward.7
= control target key start
LH: loop header
LB: loop body
LE: loop exit
PB: predicated region body
PF: predicated region fallthrough
CT: control target
= control target key end

     0   :  { %v209_v0 = vmov 0.0   ;;  %vm18_vm0 = vcmask 261120   ;;  %vm210_vm1 = vmmov 0   ;;  %v82_v13 = vlaneseq  ;;  %s260_s1 = inlined_call_operand.vmem [shape: f32[16,32], index: 1, kind: input, shape index: {}]   ;;  %s261_s0 = inlined_call_operand.vmem [shape: f32[8,32], index: 0, kind: input, shape index: {}]   ;;  %s262_s3 = inlined_call_operand.vmem [shape: s32[8,1], index: 3, kind: output, shape index: {1}]   ;;  %s263_s2 = inlined_call_operand.vmem [shape: f32[8,32], index: 2, kind: output, shape index: {0}]  }
   0x1   :  { %195 = vmatprep.subr.bf16.mxu0 %v209_v0  ;;  %v15_v1 = vld [vmem:[%s260_s1] sm:$0xff]  ;;  %v16_v2 = vld [vmem:[%s260_s1 + $0x8] sm:$0xff]  ;;  %197 = vmatprep.mubr.msk.bf16.mxu0 %vm210_vm1, %v209_v0  ;;  %vm93_vm2 = vcmask 130112   ;;  %vm109_vm3 = vcmask 130048   ;;  %vm130_vm6 = vcmask 7168  }
   0x2   :  { %v31_v3 = vpack.c.bf16 %v16_v2, %v15_v1  ;;  %v14_v4 = vld [vmem:[%s261_s0] sm:$0xff]  ;;  %v22_v5 = vmul.f32 %v15_v1, %v15_v1  ;;  %v23_v6 = vmul.f32 %v16_v2, %v16_v2  ;;  %201 = vmatprep.subr.bf16.mxu1 %v209_v0  ;;  %203 = vmatprep.mubr.msk.bf16.mxu1 %vm210_vm1, %v209_v0  ;;  %v83_v14 = vand.u32 127, %v82_v13 }
   0x3   :  { %v17_v7 = vmul.f32 %v14_v4, %v14_v4  ;;  %v30_v12 = vpack.c.bf16 %v14_v4, %v14_v4  ;;  %v85_v16 = vshrl.u32 %v82_v13, 7 }
   0x4   :  { %v36_v8 = vsel %vm18_vm0, %v31_v3, 0  ;;  %v24_v9 = vsel %vm18_vm0, %v22_v5, 0.0  ;;  %202 = vmatpush3.bf16.msra.mxu1 %v31_v3  ;;  %v27_v11 = vsel %vm18_vm0, %v23_v6, 0.0  ;;  %v88_v17 = vadd.s32 4294967288, %v83_v14 }
   0x5   :  { %196 = vmatpush3.bf16.xpose.msra.mxu0 %v36_v8  ;;  %25 = vadd.xlane.f32.xlu0 %v24_v9  ;;  %v19_v10 = vsel %vm18_vm0, %v17_v7, 0.0  ;;  %v86_v18 = vsub.s32 %v83_v14, %v85_v16 }
   0x6   :  { %20 = vadd.xlane.f32.xlu1 %v19_v10  ;;  %v91_v19 = vsub.s32 %v88_v17, %v85_v16 }
   0x9   :  { %28 = vadd.xlane.f32.xlu0 %v27_v11 }
   0xc   :  { %198 = vmatmul.mubr.msk.bf16.vlgmr.msra.gmra.mrb[0].mxu0 %vm18_vm0, %v30_v12 }
  0x92   :  { %v26_v15 = vpop.xlane.xlu0 %25 }
  0x93   :  { %v87_v21 = vrot.slane %v26_v15, %v86_v18  ;;  %v21_v24 = vpop.xlane.xlu1 %20 }
  0x96   :  { %v29_v20 = vpop.xlane.xlu0 %28 }
  0x97   :  { %v92_v22 = vrot.slane %v29_v20, %v91_v19 }
  0x99   :  { %v94_v30 = vsel %vm93_vm2, %v92_v22, %v87_v21 }
  0xdf   :  { %v72_v23 = vpop.f32.mrb[0].mxu0 }
  0xe0   :  { %v78_v25 = vmul.f32 2.0, %v72_v23  ;;  %v199_v26 = vpop.f32.mrb[1].mxu0 }
  0xe1   :  { %v75_v27 = vpop.f32.mrb[2].mxu0 }
  0xe2   :  { %v79_v28 = vsub.f32 %v21_v24, %v78_v25  ;;  %v200_v29 = vpop.f32.mrb[3].mxu0 }
  0xe4   :  { %v108_v31 = vadd.f32 %v94_v30, %v79_v28 }
  0xe6   :  { %v110_v32 = vsel %vm109_vm3, %v108_v31, inf }
  0xe7   :  { %111 = vmin.xlane.f32.xlu1 %v110_v32 }
 0x174   :  { %v112_v33 = vpop.xlane.xlu1 %111 }
 0x175   :  { %vm113_vm4 = vcmp.le.f32.partialorder %v108_v31, %v112_v33 }
 0x176   :  { %v114_v34 = vsel %vm113_vm4, %v83_v14, 16 }
 0x177   :  { %v115_v35 = vsel %vm109_vm3, %v114_v34, 2147483647 }
 0x178   :  { %v117_v36 = vshra.s32 %v115_v35, 16  ;;  %v116_v38 = vand.u32 65535, %v115_v35 }
 0x17a   :  { %v119_v37 = vcvt.s32.f32 %v117_v36  ;;  %v118_v40 = vcvt.s32.f32 %v116_v38 }
 0x17c   :  { %120 = vmin.xlane.f32.xlu0 %v119_v37 }
 0x209   :  { %v121_v39 = vpop.xlane.xlu0 %120 }
 0x20a   :  { %vm122_vm5 = vcmp.eq.f32.partialorder %v119_v37, %v121_v39  ;;  %v127_v42 = vcvt.f32.s32 %v121_v39 }
 0x20b   :  { %v123_v41 = vsel %vm122_vm5, %v118_v40, inf }
 0x20c   :  { %124 = vmin.xlane.f32.xlu1 %v123_v41  ;;  %v128_v44 = vshll.u32 %v127_v42, 16 }
 0x299   :  { %v125_v43 = vpop.xlane.xlu1 %124 }
 0x29a   :  { %v126_v45 = vcvt.f32.s32 %v125_v43 }
 0x29c   :  { %v129_v46 = vadd.s32 %v128_v44, %v126_v45 }
 0x29e   :  { %131 = vst.msk [vmem:[%s262_s3] sm:$0xff] %vm130_vm6, %v129_v46  ;;  %vm132_vm7 = vcmp.eq.s32.totalorder %v83_v14, %v129_v46 }
 0x29f   :  { %v189_v47 = vsel %vm132_vm7, 1.0, %v209_v0 }
 0x2a0   :  { %v135_v48 = vpack.c.bf16 %v189_v47, %v189_v47 }
 0x2a2   :  { %204 = vmatmul.mubr.msk.bf16.vlgmr.msra.gmra.mrb[0].mxu1 %vm109_vm3, %v135_v48 }
 0x375   :  { %v173_v49 = vpop.f32.mrb[0].mxu1 }
 0x376   :  { %179 = vst.msk [vmem:[%s263_s2] sm:$0xff] %vm18_vm0, %v173_v49  ;;  %v205_v50 = vpop.f32.mrb[1].mxu1 }
 0x377   :  { %v176_v51 = vpop.f32.mrb[2].mxu1 }
 0x378   :  { %v206_v52 = vpop.f32.mrb[3].mxu1 }

// kernel: tokenizer_forward.6
= control target key start
LH: loop header
LB: loop body
LE: loop exit
PB: predicated region body
PF: predicated region fallthrough
CT: control target
= control target key end

     0   :  { %s2093_s18 = smov 0   ;;  %s2095_s19 = smov 0   ;;  %s2370_s0 = inlined_call_operand.vmem [shape: f32[2,12,32], index: 0, kind: input, shape index: {}, may-alias: {0,15}]   ;;  %s2371_s1 = inlined_call_operand.vmem [shape: f32[2,1,32], index: 1, kind: input, shape index: {}, may-alias: {1,7}]   ;;  %s2372_s2 = inlined_call_operand.vmem [shape: f32[2,1,32], index: 2, kind: input, shape index: {}, may-alias: {2,6,8,12}]   ;;  %s2373_s3 = inlined_call_operand.vmem [shape: bf16[2,32,96], index: 3, kind: input, shape index: {}]   ;;  %s2374_s4 = inlined_call_operand.vmem [shape: f32[2,1,96], index: 4, kind: input, shape index: {}]   ;;  %s2375_s5 = inlined_call_operand.vmem [shape: bf16[2,32,32], index: 5, kind: input, shape index: {}]   ;;  %s2376_s6 = inlined_call_operand.vmem [shape: f32[2,1,32], index: 6, kind: input, shape index: {}, may-alias: {2,6,8,12}]   ;;  %s2377_s7 = inlined_call_operand.vmem [shape: f32[2,1,32], index: 7, kind: input, shape index: {}, may-alias: {1,7}]   ;;  %s2378_s8 = inlined_call_operand.vmem [shape: f32[2,1,32], index: 8, kind: input, shape index: {}, may-alias: {2,6,8,12}]   ;;  %s2379_s9 = inlined_call_operand.vmem [shape: bf16[2,32,128], index: 9, kind: input, shape index: {}]   ;;  %s2380_s10 = inlined_call_operand.vmem [shape: f32[2,1,128], index: 10, kind: input, shape index: {}]   ;;  %s2381_s11 = inlined_call_operand.vmem [shape: bf16[2,128,32], index: 11, kind: input, shape index: {}]   ;;  %s2382_s12 = inlined_call_operand.vmem [shape: f32[2,1,32], index: 12, kind: input, shape index: {}, may-alias: {2,6,8,12}]   ;;  %s2383_s13 = inlined_call_operand.vmem [shape: f32[1,32], index: 13, kind: input, shape index: {}]   ;;  %s2384_s14 = inlined_call_operand.vmem [shape: f32[1,32], index: 14, kind: input, shape index: {}]   ;;  %s2385_s15 = inlined_call_operand.vmem [shape: f32[2,12,32], index: 15, kind: output, shape index: {}, may-alias: {0,15}]  }
   0x1   :  { %2390 = sst [smem:[#allocation10_spill]] %s2370_s0  ;;  %s2097_s20 = smov 0  }
   0x2   :  { %2391 = sst [smem:[#allocation11_spill]] %s2372_s2  ;;  %s2099_s21 = smov 0  }
   0x3   :  { %2392 = sst [smem:[#allocation12_spill]] %s2373_s3  ;;  %s2101_s22 = smov 0  }
   0x4   :  { %2393 = sst [smem:[#allocation13_spill]] %s2375_s5 }
   0x5   :  { %2394 = sst [smem:[#allocation14_spill]] %s2383_s13 }
   0x6   :  { %2395 = sst [smem:[#allocation15_spill]] %s2384_s14 }
   0x7   :  { %2396 = sst [smem:[#allocation16_spill]] %s2385_s15 }
   0x8 LB: > { %2397 = sst [smem:[#allocation4_spill]] %s1987_s18  ;;  %s34_s23 = sadd.s32 1, %s1995_s20  ;;  %s2003_s22 = sphi %s2101_s22, %s25_s22   ;;  %s1999_s21 = sphi %s2099_s21, %s2424_s21   ;;  %s1995_s20 = sphi %s2097_s20, %s2423_s20   ;;  %s1991_s19 = sphi %s2095_s19, %s2422_s19   ;;  %s1987_s18 = sphi %s2093_s18, %s2421_s18  }
   0x9   : > { %2398 = sst [smem:[#allocation5_spill]] %s1995_s20  ;;  %s37_s24 = sadd.s32 1, %s1999_s21 }
   0xa   : > { %2399 = sst [smem:[#allocation6_spill]] %s1999_s21  ;;  %p35_p0 = scmp.ge.s32.totalorder %s34_s23, 2 }
   0xb   : > { %2400 = sst [smem:[#allocation7_spill]] %s2003_s22  ;;  %p1704_p1 = scmp.ge.s32.totalorder %s2003_s22, 1 }
   0xc   : > { %p553_p2 = scmp.lt.s32.totalorder %s2003_s22, 5  ;;  %s2426_s23 = smov (%p35_p0, %s34_s23), 0 }
   0xd   : > { %2401 = sst [smem:[#allocation8_spill]] %s2426_s23  ;;  %s2428_s24 = smov (!%p35_p0, %s37_s24), %s1999_s21 }
   0xe   : > { %p554_p3 = pnand %p1704_p1, %p553_p2  ;;  %p39_p4 = scmp.ge.s32.totalorder %s2428_s24, 2 }
   0xf   : > { %p645_p5 = scmp.lt.s32.totalorder (!%p554_p3), %s1991_s19, 1  ;;  %p650_p6 = scmp.lt.s32.totalorder (!%p554_p3), %s1987_s18, 1 }
  0x10   : > { %s2430_s24 = smov (%p39_p4, %s2428_s24), 0  ;;  %557 = sbr.rel (%p554_p3) target bundleno = 2921 (0xb69), region = 80 }
  0x11   : > { %2402 = sst [smem:[#allocation9_spill]] %s2430_s24  ;;  %s2403_s0 = sld [smem:[#allocation10_spill]] (!%p554_p3) }
  0x12   : > { %s2405_s3 = sld [smem:[#allocation12_spill]] (!%p554_p3)  ;;  %s2406_s5 = sld [smem:[#allocation13_spill]] (!%p554_p3) }
  0x17   : > { %s2432_s19 = smov (!%p645_p5, %s1991_s19), 1 }
  0x18   : > { %s2127_s25 = scalar_select %p650_p6, %s1987_s18, 1 }
  0x19   : > { %s1762_s26 = sshll.u32 %s2432_s19, 4 }
  0x1a   : > { %s649_s29 = scalar_lea.vmem %s2403_s0, %s1762_s26  ;;  %s1763_s20 = sshll.u32 %s2127_s25, 4 }
  0x1b   : > { %s2144_s13 = scalar_lea.vmem %s2405_s3, %s1763_s20  ;;  %s2153_s0 = scalar_lea.vmem %s2406_s5, %s1763_s20 }
  0x1c   : > { %s2170_s19 = scalar_lea.vmem %s2379_s9, %s1763_s20  ;;  %s685_s15 = scalar_lea.vmem %s2380_s10, %s2127_s25 }
  0x1d   : > { %s1766_s5 = sshll.u32 %s2127_s25, 6  ;;  %s693_s23 = scalar_lea.vmem %s2382_s12, %s2127_s25 }
  0x1e   : > { %s2184_s17 = scalar_lea.vmem %s2381_s11, %s1766_s5  ;;  %s2407_s3 = sld [smem:[#allocation16_spill]] }
  0x1f   : > { %s2408_s20 = sld [smem:[#allocation4_spill]] }
  0x24   : > { %s2189_s2 = scalar_lea.vmem %s2407_s3, %s1762_s26 }
  0x25   : > { %p1717_p7 = scmp.ne.s32.totalorder %s2408_s20, 0 }
  0x26   : > { %v704_v0 = vld [vmem:[%s649_s29] sm:$0xff] (!%p1717_p7)  ;;  %v705_v1 = vld [vmem:[%s649_s29 + $0x8] sm:$0xf] (!%p1717_p7)  ;;  %vm706_vm0 = vcmask (!%p1717_p7), 261120   ;;  %vm708_vm1 = vcmask (!%p1717_p7), 257024  }
  0x27   : > { %703 = sbr.rel (%p1717_p7) target bundleno = 46 (0x2e), region = 84  ;;  %707 = vst.msk [vmem:[%s2189_s2] sm:$0xff] (!%p1717_p7), %vm706_vm0, %v704_v0 }
  0x28   : > { %709 = vst.msk [vmem:[%s2189_s2 + $0x8] sm:$0xf] (!%p1717_p7), %vm708_vm1, %v705_v1 }
  0x2e PF: > { %v2195_v2 = vld [vmem:[%s2189_s2] sm:$0xff]  ;;  %vm714_vm2 = vcmask 261120   ;;  %vm718_vm3 = vcmask 257024   ;;  %v2005_v17 = vmov 0.0   ;;  %v1917_v18 = vld [vmem:[%s2144_s13 + $0x8] sm:$0xff]   ;;  %vm2006_vm4 = vmmov 0   ;;  %s2412_s16 = scalar_lea.vmem %s2374_s4, %s2127_s25  ;;  %s2415_s28 = scalar_lea.vmem %s2378_s8, %s2127_s25 }
  0x2f   : > { %v2198_v3 = vld [vmem:[%s2189_s2 + $0x8] sm:$0xf]  ;;  %v715_v4 = vsel %vm714_vm2, %v2195_v2, 0.0  ;;  %v1916_v16 = vld [vmem:[%s2144_s13] sm:$0xff]   ;;  %1800 = vmatprep.subr.bf16.mxu0 %v2005_v17  ;;  %1820 = vmatprep.subr.bf16.mxu1 %v2005_v17  ;;  %s2409_s13 = scalar_lea.vmem %s2371_s1, %s2127_s25  ;;  %s2410_s18 = sld [smem:[#allocation11_spill]]  ;;  %vm835_vm5 = vcmask 781312  }
  0x30   : > { %v719_v5 = vsel %vm718_vm3, %v2198_v3, 0.0  ;;  %716 = vadd.xlane.f32.xlu0 %v715_v4  ;;  %1801 = vmatpush3.bf16.msra.mxu0 %v1916_v16  ;;  %v1718_v27 = vld [vmem:[%s2409_s13] ss:$0 sm:$0xff]  ;;  %vm837_vm6 = vcmask 779264   ;;  %s2007_s21 = smov 80   ;;  %s2008_s24 = smov 96  }
  0x31   : > { %1804 = vmatprep.mubr.msk.bf16.mxu0 %vm2006_vm4, %v2005_v17  ;;  %1802 = vmatprep.subr.bf16.mxu0 %v2005_v17  ;;  %v1720_v36 = vld [vmem:[%s2412_s16] ss:$0 sm:$0xff]  ;;  %s2009_s14 = smov 112   ;;  %vm848_vm7 = vcmask 130048   ;;  %vm898_vm8 = vcmask 97280   ;;  %vm902_vm9 = vcmask 93184   ;;  %s2413_s13 = scalar_lea.vmem %s2376_s6, %s2127_s25 }
  0x32   : > { %1822 = vmatprep.mubr.msk.bf16.mxu1 %vm2006_vm4, %v2005_v17  ;;  %s2010_s22 = smov 64   ;;  %s2011_s20 = smov 48   ;;  %vm928_vm10 = vcmask 1045504   ;;  %vm981_vm11 = vcmask 125952   ;;  %vm983_vm12 = vcmask 123904   ;;  %vm1129_vm13 = vcmask 257152  }
  0x33   : > { %s2012_s3 = smov 16   ;;  %vm1131_vm14 = vcmask 255104  }
  0x34   : > { %720 = vadd.xlane.f32.xlu0 %v719_v5  ;;  %1803 = vmatpush3.bf16.msra.mxu0 %v1917_v18 }
  0x35   : > { %1808 = vmatprep.subr.bf16.mxu0 %v2005_v17  ;;  %s2411_s27 = scalar_lea.vmem %s2410_s18, %s2127_s25 }
  0x36   : > { %v1719_v31 = vld [vmem:[%s2411_s27] ss:$0 sm:$0xff] }
  0xbd   : > { %v717_v6 = vpop.xlane.xlu0 %716 }
  0xbe   : > { %v723_v7 = vmul.f32 0.03125, %v717_v6 }
  0xc0   : > { %v725_v8 = vsub.f32 %v2195_v2, %v723_v7 }
  0xc1   : > { %v721_v9 = vpop.xlane.xlu0 %720 }
  0xc2   : > { %v724_v10 = vmul.f32 0.03125, %v721_v9  ;;  %v727_v11 = vmul.f32 %v725_v8, %v725_v8 }
  0xc4   : > { %v726_v12 = vsub.f32 %v2198_v3, %v724_v10  ;;  %v729_v13 = vsel %vm714_vm2, %v727_v11, 0.0 }
  0xc5   : > { %730 = vadd.xlane.f32.xlu1 %v729_v13 }
  0xc6   : > { %v728_v14 = vmul.f32 %v726_v12, %v726_v12 }
  0xc8   : > { %v732_v15 = vsel %vm718_vm3, %v728_v14, 0.0 }
  0xc9   : > { %733 = vadd.xlane.f32.xlu1 %v732_v15 }
 0x152   : > { %v731_v19 = vpop.xlane.xlu1 %730 }
 0x153   : > { %v735_v20 = vmul.f32 0.03125, %v731_v19 }
 0x155   : > { %v737_v21 = vadd.f32 1e-05, %v735_v20 }
 0x156   : > { %v734_v22 = vpop.xlane.xlu1 %733 }
 0x157   : > { %1933 = vrsqrt.f32 %v737_v21  ;;  %v736_v23 = vmul.f32 0.03125, %v734_v22 }
 0x159   : > { %v738_v24 = vadd.f32 1e-05, %v736_v23 }
 0x15b   : > { %1935 = vrsqrt.f32 %v738_v24 }
 0x161   : > { %v1934_v25 = vpop.eup %1933 }
 0x162   : > { %v741_v26 = vmul.f32 %v1934_v25, %v725_v8 }
 0x164   : > { %v749_v30 = vmul.f32 %v1718_v27, %v741_v26 }
 0x165   : > { %v1936_v28 = vpop.eup %1935 }
 0x166   : > { %v742_v29 = vmul.f32 %v1936_v28, %v726_v12  ;;  %v757_v33 = vadd.f32 %v1719_v31, %v749_v30 }
 0x168   : > { %v750_v32 = vmul.f32 %v1718_v27, %v742_v29 }
 0x16a   : > { %v758_v34 = vadd.f32 %v1719_v31, %v750_v32 }
 0x16c   : > { %v763_v35 = vpack.c.bf16 %v758_v34, %v757_v33 }
 0x16e   : > { %1805 = vmatmul.mubr.msk.bf16.vlgmr.msra.gmra.mrb[0].mxu0 %vm714_vm2, %v763_v35 }
 0x16f   : > { %1810 = vmatprep.mubr.msk.bf16.mxu0 %vm2006_vm4, %v2005_v17 }
 0x241   : > { %v820_v37 = vpop.f32.mrb[0].mxu0 }
 0x242   : > { %v821_v38 = vadd.f32 %v1720_v36, %v820_v37  ;;  %v1806_v39 = vpop.f32.mrb[1].mxu0 }
 0x243   : > { %v823_v40 = vpop.f32.mrb[2].mxu0 }
 0x244   : > { %v1768_v41 = vpack.c.bf16 %v821_v38, %v821_v38  ;;  %v824_v42 = vadd.f32 %v1720_v36, %v823_v40  ;;  %v1807_v43 = vpop.f32.mrb[3].mxu0 }
 0x246   : > { %836 = vst.msk [vmem:[#allocation2] sm:$0xf] %vm835_vm5, %v1768_v41  ;;  %v1769_v44 = vpack.c.bf16 %v824_v42, %v824_v42 }
 0x248   : > { %838 = vst.msk [vmem:[#allocation2 + $0x4] sm:$0x3] %vm837_vm6, %v1769_v44 }
 0x24f   : > { %v2236_v45 = vld [vmem:[#allocation2] sm:$0x3f]  }
 0x250   : > { %v2238_v46 = vld [vmem:[#allocation2] sm:$0x3f]   ;;  %994 = vrot.lane.b32.xlu1 %v2236_v45, %s2007_s21  ;;  %s2416_s21 = sld [smem:[#allocation4_spill]] }
 0x251   : > { %846 = vrot.lane.b32.xlu0 %v2238_v46, %s2008_s24 }
 0x254   : > { %992 = vrot.lane.b32.xlu1 %v2236_v45, %s2009_s14 }
 0x256   : > { %p1756_p8 = scmp.ge.s32.totalorder %s2416_s21, 1 }
 0x2c2   : > { %v995_v47 = vpop.permute.xlu1 %994 }
 0x2c3   : > { %v847_v48 = vpop.permute.xlu0 %846  ;;  %v1000_v49 = vsel %vm848_vm7, %v995_v47, 0 }
 0x2c4   : > { %v853_v50 = vsel %vm848_vm7, %v847_v48, 0  ;;  %1821 = vmatpush3.bf16.xpose.msra.mxu1 %v1000_v49  ;;  %v1920_v49 = vld [vmem:[%s2153_s0] sm:$0xff]  }
 0x2c5   : > { %1809 = vmatpush3.bf16.xpose.msra.mxu0 %v853_v50  ;;  %1832 = vmatprep.subr.bf16.mxu1 %v2005_v17 }
 0x2c6   : > { %1814 = vmatprep.subr.bf16.mxu0 %v2005_v17  ;;  %v993_v51 = vpop.permute.xlu1 %992 }
 0x2cb   : > { %1823 = vmatmul.mubr.msk.bf16.vlgmr.msra.gmra.mrb[0].mxu1 %vm848_vm7, %v993_v51 }
 0x2cc   : > { %1811 = vmatmul.mubr.msk.bf16.vlgmr.msra.gmra.mrb[4].mxu0 %vm848_vm7, %v2238_v46  ;;  %1836 = vmatprep.mubr.msk.bf16.mxu1 %vm2006_vm4, %v2005_v17 }
 0x2cd   : > { %1816 = vmatprep.mubr.msk.bf16.mxu0 %vm2006_vm4, %v2005_v17  ;;  %1833 = vmatpush3.bf16.msra.mxu1 %v1920_v49 }
 0x2ce   : > { %1834 = vmatprep.subr.bf16.mxu1 %v2005_v17 }
 0x39e   : > { %v1036_v52 = vpop.f32.mrb[0].mxu1 }
 0x39f   : > { %v889_v53 = vpop.f32.mrb[4].mxu0  ;;  %v1824_v54 = vpop.f32.mrb[1].mxu1  ;;  %v1043_v63 = vmul.f32 0.25, %v1036_v52  ;;  %v1921_v52 = vld [vmem:[%s2153_s0 + $0x8] sm:$0xff]  }
 0x3a0   : > { %v896_v55 = vmul.f32 0.25, %v889_v53  ;;  %v1812_v56 = vpop.f32.mrb[5].mxu0  ;;  %v1039_v57 = vpop.f32.mrb[2].mxu1  ;;  %1835 = vmatpush3.bf16.msra.mxu1 %v1921_v52 }
 0x3a1   : > { %v892_v58 = vpop.f32.mrb[6].mxu0  ;;  %v1825_v59 = vpop.f32.mrb[3].mxu1  ;;  %v1044_v1 = vmul.f32 0.25, %v1039_v57  ;;  %v1045_v4 = vsel %vm898_vm8, %v1043_v63, -inf  ;;  %1848 = vmatprep.subr.bf16.mxu1 %v2005_v17 }
 0x3a2   : > { %v897_v60 = vmul.f32 0.25, %v892_v58  ;;  %v1813_v61 = vpop.f32.mrb[7].mxu0  ;;  %v899_v62 = vsel %vm898_vm8, %v896_v55, -inf }
 0x3a3   : > { %900 = vmax.xlane.f32.xlu1 %v899_v62  ;;  %v1048_v5 = vsel %vm902_vm9, %v1044_v1, -inf }
 0x3a4   : > { %v903_v0 = vsel %vm902_vm9, %v897_v60, -inf }
 0x3a5   : > { %904 = vmax.xlane.f32.xlu0 %v903_v0 }
 0x3a9   : > { %1046 = vmax.xlane.f32.xlu0 %v1045_v4 }
 0x3ad   : > { %1049 = vmax.xlane.f32.xlu0 %v1048_v5 }
 0x430   : > { %v901_v6 = vpop.xlane.xlu1 %900 }
 0x431   : > { %v906_v7 = vsub.f32 %v896_v55, %v901_v6 }
 0x432   : > { %v905_v8 = vpop.xlane.xlu0 %904 }
 0x433   : > { %v908_v9 = vmul.f32 1.442695, %v906_v7  ;;  %v907_v10 = vsub.f32 %v897_v60, %v905_v8 }
 0x435   : > { %1937 = vpow2.f32 %v908_v9  ;;  %v910_v11 = vmul.f32 1.442695, %v907_v10 }
 0x436   : > { %v1047_v12 = vpop.xlane.xlu0 %1046 }
 0x437   : > { %1939 = vpow2.f32 %v910_v11  ;;  %v1051_v13 = vsub.f32 %v1043_v63, %v1047_v12  ;;  %v1740_v63 = vld [vmem:[%s2413_s13] ss:$0 sm:$0xff] }
 0x439   : > { %v1053_v14 = vmul.f32 1.442695, %v1051_v13 }
 0x43a   : > { %v1050_v15 = vpop.xlane.xlu0 %1049 }
 0x43b   : > { %1941 = vpow2.f32 %v1053_v14  ;;  %v1052_v16 = vsub.f32 %v1044_v1, %v1050_v15 }
 0x43d   : > { %v1055_v18 = vmul.f32 1.442695, %v1052_v16 }
 0x43f   : > { %v1938_v19 = vpop.eup %1937  ;;  %1943 = vpow2.f32 %v1055_v18 }
 0x440   : > { %v912_v20 = vsel %vm898_vm8, %v1938_v19, 0.0 }
 0x441   : > { %v1940_v21 = vpop.eup %1939  ;;  %913 = vadd.xlane.f32.xlu1 %v912_v20  ;;  %v1923_v20 = vld [vmem:[%s2170_s19] sm:$0xff]  }
 0x442   : > { %v915_v22 = vsel %vm902_vm9, %v1940_v21, 0.0 }
 0x443   : > { %916 = vadd.xlane.f32.xlu0 %v915_v22 }
 0x445   : > { %v1942_v23 = vpop.eup %1941 }
 0x446   : > { %v1057_v24 = vsel %vm898_vm8, %v1942_v23, 0.0 }
 0x447   : > { %1058 = vadd.xlane.f32.xlu1 %v1057_v24 }
 0x449   : > { %v1944_v25 = vpop.eup %1943 }
 0x44a   : > { %v1060_v26 = vsel %vm902_vm9, %v1944_v25, 0.0 }
 0x44b   : > { %1061 = vadd.xlane.f32.xlu0 %v1060_v26 }
 0x458   : > { %923 = vrot.lane.b32.xlu1 %v2238_v46, %s2010_s22 }
 0x461   : > { %1068 = vrot.lane.b32.xlu0 %v2236_v45, %s2011_s20 }
 0x4ce   : > { %v914_v27 = vpop.xlane.xlu1 %913 }
 0x4cf   : > { %1945 = vrcp.f32 %v914_v27 }
 0x4d0   : > { %v917_v28 = vpop.xlane.xlu0 %916 }
 0x4d1   : > { %1947 = vrcp.f32 %v917_v28 }
 0x4d4   : > { %v1059_v29 = vpop.xlane.xlu1 %1058 }
 0x4d5   : > { %1949 = vrcp.f32 %v1059_v29 }
 0x4d8   : > { %v924_v30 = vpop.permute.xlu1 %923  ;;  %v1062_v31 = vpop.xlane.xlu0 %1061 }
 0x4d9   : > { %v1946_v32 = vpop.eup %1945  ;;  %v930_v33 = vsel %vm928_vm10, %v924_v30, 0  ;;  %1951 = vrcp.f32 %v1062_v31 }
 0x4da   : > { %1815 = vmatpush3.bf16.msra.mxu0 %v930_v33  ;;  %v920_v35 = vmul.f32 %v1946_v32, %v1938_v19 }
 0x4db   : > { %v1948_v34 = vpop.eup %1947  ;;  %1826 = vmatprep.subr.bf16.mxu0 %v2005_v17 }
 0x4dc   : > { %v921_v36 = vmul.f32 %v1948_v34, %v1940_v21  ;;  %v1069_v37 = vpop.permute.xlu0 %1068  ;;  %v1924_v21 = vld [vmem:[%s2170_s19 + $0x8] sm:$0xff]   ;;  %s2414_s19 = scalar_lea.vmem %s2377_s7, %s2127_s25  ;;  %v1742_v34 = vld [vmem:[%s2415_s28] ss:$0 sm:$0xff] }
 0x4dd   : > { %v1074_v39 = vsel %vm928_vm10, %v1069_v37, 0  ;;  %v1741_v30 = vld [vmem:[%s2414_s19] ss:$0 sm:$0xff] }
 0x4de   : > { %v922_v38 = vpack.c.bf16 %v921_v36, %v920_v35 }
 0x4df   : > { %v1950_v40 = vpop.eup %1949 }
 0x4e0   : > { %1817 = vmatmul.mubr.msk.bf16.vlgmr.msra.gmra.mrb[8].mxu0 %vm898_vm8, %v922_v38  ;;  %v1065_v42 = vmul.f32 %v1950_v40, %v1942_v23  ;;  %v1926_v40 = vld [vmem:[%s2184_s17 + $0x8] sm:$0xff]  }
 0x4e1   : > { %1827 = vmatpush3.bf16.msra.mxu0 %v1074_v39  ;;  %1828 = vmatprep.mubr.msk.bf16.mxu0 %vm2006_vm4, %v2005_v17  ;;  %v1925_v39 = vld [vmem:[%s2184_s17] sm:$0xff]  }
 0x4e2   : > { %1840 = vmatprep.subr.bf16.mxu0 %v2005_v17 }
 0x4e3   : > { %v1952_v41 = vpop.eup %1951 }
 0x4e4   : > { %v1066_v43 = vmul.f32 %v1952_v41, %v1944_v25  ;;  %v1927_v41 = vld [vmem:[%s2184_s17 + $0x10] sm:$0xff]  }
 0x4e6   : > { %v1067_v44 = vpack.c.bf16 %v1066_v43, %v1065_v42  ;;  %v1928_v42 = vld [vmem:[%s2184_s17 + $0x18] sm:$0xff]   ;;  %v1929_v43 = vld [vmem:[%s2184_s17 + $0x20] sm:$0xff]  }
 0x4e8   : > { %1829 = vmatmul.mubr.msk.bf16.vlgmr.msra.gmra.mrb[12].mxu0 %vm898_vm8, %v1067_v44  ;;  %v1930_v44 = vld [vmem:[%s2184_s17 + $0x28] sm:$0xff]  }
 0x4e9   : > { %1844 = vmatprep.mubr.msk.bf16.mxu0 %vm2006_vm4, %v2005_v17  ;;  %1841 = vmatpush3.bf16.msra.mxu0 %v1923_v20 }
 0x4ea   : > { %1842 = vmatprep.subr.bf16.mxu0 %v2005_v17 }
 0x4ed   : > { %1843 = vmatpush3.bf16.msra.mxu0 %v1924_v21 }
 0x5b3   : > { %v966_v45 = vpop.f32.mrb[8].mxu0 }
 0x5b4   : > { %v1770_v46 = vpack.c.bf16 %v966_v45, %v966_v45  ;;  %v1818_v47 = vpop.f32.mrb[9].mxu0  ;;  %v1931_v45 = vld [vmem:[%s2184_s17 + $0x30] sm:$0xff]  }
 0x5b5   : > { %v969_v48 = vpop.f32.mrb[10].mxu0  ;;  %v1743_v47 = vld [vmem:[%s685_s15] ss:$0 sm:$0xff] }
 0x5b6   : > { %982 = vst.msk [vmem:[#allocation3] sm:$0xf] %vm981_vm11, %v1770_v46  ;;  %v1771_v50 = vpack.c.bf16 %v969_v48, %v969_v48  ;;  %v1819_v51 = vpop.f32.mrb[11].mxu0  ;;  %v1932_v46 = vld [vmem:[%s2184_s17 + $0x38] sm:$0xff]  }
 0x5b8   : > { %984 = vst.msk [vmem:[#allocation3 + $0x4] sm:$0x3] %vm983_vm12, %v1771_v50 }
 0x5bb   : > { %v1110_v53 = vpop.f32.mrb[12].mxu0 }
 0x5bc   : > { %v1772_v54 = vpack.c.bf16 %v1110_v53, %v1110_v53  ;;  %v1830_v55 = vpop.f32.mrb[13].mxu0 }
 0x5bd   : > { %v1113_v56 = vpop.f32.mrb[14].mxu0 }
 0x5be   : > { %1123 = vrot.lane.b32.xlu1 %v1772_v54, %s2012_s3  ;;  %v1831_v57 = vpop.f32.mrb[15].mxu0  ;;  %v1773_v58 = vpack.c.bf16 %v1113_v56, %v1113_v56 }
 0x5c2   : > { %1125 = vrot.lane.b32.xlu1 %v1773_v58, %s2012_s3 }
 0x630   : > { %v1124_v59 = vpop.permute.xlu1 %1123 }
 0x631   : > { %1130 = vst.msk [vmem:[#allocation3] sm:$0xf] %vm1129_vm13, %v1124_v59 }
 0x634   : > { %v1126_v60 = vpop.permute.xlu1 %1125 }
 0x635   : > { %1132 = vst.msk [vmem:[#allocation3 + $0x4] sm:$0x3] %vm1131_vm14, %v1126_v60 }
 0x63c   : > { %v1922_v61 = vld [vmem:[#allocation3] sm:$0x3f]  }
 0x63d   : > { %1837 = vmatmul.mubr.msk.bf16.vlgmr.msra.gmra.mrb[4].mxu1 %vm714_vm2, %v1922_v61 }
 0x63e   : > { %1864 = vmatprep.mubr.msk.bf16.mxu1 %vm2006_vm4, %v2005_v17  ;;  %1849 = vmatpush3.bf16.msra.mxu1 %v1925_v39 }
 0x63f   : > { %1850 = vmatprep.subr.bf16.mxu1 %v2005_v17 }
 0x642   : > { %1851 = vmatpush3.bf16.msra.mxu1 %v1926_v40 }
 0x643   : > { %1852 = vmatprep.subr.bf16.mxu1 %v2005_v17 }
 0x646   : > { %1853 = vmatpush3.bf16.msra.mxu1 %v1927_v41 }
 0x647   : > { %1854 = vmatprep.subr.bf16.mxu1 %v2005_v17 }
 0x64a   : > { %1855 = vmatpush3.bf16.msra.mxu1 %v1928_v42 }
 0x64b   : > { %1856 = vmatprep.subr.bf16.mxu1 %v2005_v17 }
 0x64e   : > { %1857 = vmatpush3.bf16.msra.mxu1 %v1929_v43 }
 0x64f   : > { %1858 = vmatprep.subr.bf16.mxu1 %v2005_v17 }
 0x652   : > { %1859 = vmatpush3.bf16.msra.mxu1 %v1930_v44 }
 0x653   : > { %1860 = vmatprep.subr.bf16.mxu1 %v2005_v17 }
 0x656   : > { %1861 = vmatpush3.bf16.msra.mxu1 %v1931_v45 }
 0x657   : > { %1862 = vmatprep.subr.bf16.mxu1 %v2005_v17 }
 0x65a   : > { %1863 = vmatpush3.bf16.msra.mxu1 %v1932_v46 }
 0x710   : > { %v1193_v62 = vpop.f32.mrb[4].mxu1 }
 0x711   : > { %v1200_v0 = vadd.f32 %v1193_v62, %v2195_v2  ;;  %v1838_v1 = vpop.f32.mrb[5].mxu1 }
 0x712   : > { %v1196_v4 = vpop.f32.mrb[6].mxu1 }
 0x713   : > { %v2281_v5 = vadd.f32 %v1740_v63, %v1200_v0  ;;  %v1201_v6 = vadd.f32 %v1196_v4, %v2198_v3  ;;  %v1839_v7 = vpop.f32.mrb[7].mxu1 }
 0x715   : > { %v2284_v8 = vadd.f32 %v1740_v63, %v1201_v6  ;;  %v1213_v9 = vsel %vm714_vm2, %v2281_v5, 0.0 }
 0x716   : > { %1214 = vadd.xlane.f32.xlu1 %v1213_v9 }
 0x717   : > { %v1216_v10 = vsel %vm718_vm3, %v2284_v8, 0.0 }
 0x718   : > { %1217 = vadd.xlane.f32.xlu0 %v1216_v10 }
 0x7a3   : > { %v1215_v2 = vpop.xlane.xlu1 %1214 }
 0x7a4   : > { %v1219_v11 = vmul.f32 0.03125, %v1215_v2 }
 0x7a5   : > { %v1218_v12 = vpop.xlane.xlu0 %1217 }
 0x7a6   : > { %v1221_v13 = vsub.f32 %v2281_v5, %v1219_v11  ;;  %v1220_v14 = vmul.f32 0.03125, %v1218_v12  ;;  %v1755_v12 = vld [vmem:[%s693_s23] ss:$0 sm:$0xff] }
 0x7a8   : > { %v1222_v3 = vsub.f32 %v2284_v8, %v1220_v14  ;;  %v1223_v15 = vmul.f32 %v1221_v13, %v1221_v13 }
 0x7aa   : > { %v1225_v16 = vsel %vm714_vm2, %v1223_v15, 0.0  ;;  %v1224_v18 = vmul.f32 %v1222_v3, %v1222_v3 }
 0x7ab   : > { %1226 = vadd.xlane.f32.xlu0 %v1225_v16 }
 0x7ac   : > { %v1228_v19 = vsel %vm718_vm3, %v1224_v18, 0.0 }
 0x7af   : > { %1229 = vadd.xlane.f32.xlu0 %v1228_v19 }
 0x838   : > { %v1227_v22 = vpop.xlane.xlu0 %1226 }
 0x839   : > { %v1231_v23 = vmul.f32 0.03125, %v1227_v22 }
 0x83b   : > { %v1233_v24 = vadd.f32 1e-05, %v1231_v23 }
 0x83c   : > { %v1230_v25 = vpop.xlane.xlu0 %1229 }
 0x83d   : > { %1953 = vrsqrt.f32 %v1233_v24  ;;  %v1232_v26 = vmul.f32 0.03125, %v1230_v25 }
 0x83f   : > { %v1234_v27 = vadd.f32 1e-05, %v1232_v26 }
 0x841   : > { %1955 = vrsqrt.f32 %v1234_v27 }
 0x847   : > { %v1954_v28 = vpop.eup %1953 }
 0x848   : > { %v1237_v29 = vmul.f32 %v1954_v28, %v1221_v13 }
 0x84a   : > { %v1245_v32 = vmul.f32 %v1741_v30, %v1237_v29 }
 0x84b   : > { %v1956_v31 = vpop.eup %1955 }
 0x84c   : > { %v1238_v33 = vmul.f32 %v1956_v31, %v1222_v3  ;;  %v1253_v36 = vadd.f32 %v1742_v34, %v1245_v32 }
 0x84e   : > { %v1246_v35 = vmul.f32 %v1741_v30, %v1238_v33 }
 0x850   : > { %v1254_v37 = vadd.f32 %v1742_v34, %v1246_v35 }
 0x852   : > { %v1259_v38 = vpack.c.bf16 %v1254_v37, %v1253_v36 }
 0x854   : > { %1845 = vmatmul.mubr.msk.bf16.vlgmr.msra.gmra.mrb[16].mxu0 %vm714_vm2, %v1259_v38 }
 0x927   : > { %v1316_v48 = vpop.f32.mrb[16].mxu0 }
 0x928   : > { %v1317_v49 = vadd.f32 %v1743_v47, %v1316_v48  ;;  %v1846_v50 = vpop.f32.mrb[17].mxu0 }
 0x929   : > { %v1319_v51 = vpop.f32.mrb[18].mxu0 }
 0x92a   : > { %v1323_v52 = vmul.f32 %v1317_v49, %v1317_v49  ;;  %v1320_v53 = vadd.f32 %v1743_v47, %v1319_v51  ;;  %v1847_v54 = vpop.f32.mrb[19].mxu0 }
 0x92c   : > { %v1325_v55 = vmul.f32 %v1323_v52, %v1317_v49  ;;  %v1324_v56 = vmul.f32 %v1320_v53, %v1320_v53 }
 0x92e   : > { %v1327_v57 = vmul.f32 0.044715, %v1325_v55  ;;  %v1326_v58 = vmul.f32 %v1324_v56, %v1320_v53 }
 0x930   : > { %v1329_v59 = vadd.f32 %v1327_v57, %v1317_v49  ;;  %v1328_v17 = vmul.f32 0.044715, %v1326_v58 }
 0x932   : > { %v1331_v60 = vmul.f32 0.7978846, %v1329_v59  ;;  %v1330_v61 = vadd.f32 %v1328_v17, %v1320_v53 }
 0x934   : > { %1957 = vtanh.f32 %v1331_v60  ;;  %v1332_v62 = vmul.f32 0.7978846, %v1330_v61 }
 0x936   : > { %1959 = vtanh.f32 %v1332_v62 }
 0x93e   : > { %v1958_v63 = vpop.eup %1957 }
 0x93f   : > { %v1335_v0 = vadd.f32 1.0, %v1958_v63 }
 0x940   : > { %v1960_v1 = vpop.eup %1959 }
 0x941   : > { %v1337_v4 = vmul.f32 0.5, %v1335_v0  ;;  %v1336_v6 = vadd.f32 1.0, %v1960_v1 }
 0x943   : > { %v1338_v7 = vmul.f32 0.5, %v1336_v6  ;;  %v1339_v9 = vmul.f32 %v1337_v4, %v1317_v49 }
 0x945   : > { %v1340_v10 = vmul.f32 %v1338_v7, %v1320_v53 }
 0x947   : > { %v1357_v2 = vpack.c.bf16 %v1340_v10, %v1339_v9 }
 0x949   : > { %1865 = vmatmul.mubr.bf16.vlgmr.msra.gmra.mrb[8].mxu1 %v1357_v2 }
 0xa1b   : > { %1461 = sbr.rel (%p1756_p8) target bundleno = 2596 (0xa24), region = 88 }
 0xa1c   : > { %v1440_v11 = vpop.f32.mrb[8].mxu1 }
 0xa1d   : > { %v1447_v13 = vadd.f32 %v1440_v11, %v2281_v5  ;;  %v1866_v14 = vpop.f32.mrb[9].mxu1 }
 0xa1e   : > { %v1443_v3 = vpop.f32.mrb[10].mxu1 }
 0xa1f   : > { %v1456_v15 = vadd.f32 %v1755_v12, %v1447_v13  ;;  %v1448_v16 = vadd.f32 %v1443_v3, %v2284_v8  ;;  %v1867_v18 = vpop.f32.mrb[11].mxu1 }
 0xa21   : > { %v1457_v19 = vadd.f32 %v1755_v12, %v1448_v16  ;;  %1462 = vst.msk [vmem:[%s2189_s2] sm:$0xff] (!%p1756_p8), %vm714_vm2, %v1456_v15 }
 0xa23   : > { %1463 = vst.msk [vmem:[%s2189_s2 + $0x8] sm:$0xf] %vm718_vm3, %v1457_v19 }
 0xa24 PF: > { %s2417_s25 = sld [smem:[#allocation4_spill]] }
 0xa2a   : > { %p1757_p9 = scmp.ne.s32.totalorder %s2417_s25, 1 }
 0xa2b   : > { %v1470_v5 = vsel (!%p1757_p9), %vm714_vm2, %v1456_v15, 0.0  ;;  %v1473_v8 = vsel (!%p1757_p9), %vm718_vm3, %v1457_v19, 0.0  ;;  %s2418_s14 = sld [smem:[#allocation14_spill]] (!%p1757_p9)  ;;  %s2419_s3 = sld [smem:[#allocation15_spill]] (!%p1757_p9) }
 0xa2c   : > { %1467 = sbr.rel (%p1757_p9) target bundleno = 2921 (0xb69), region = 92  ;;  %1471 = vadd.xlane.f32.xlu0 (!%p1757_p9), %v1470_v5 }
 0xa30   : > { %1474 = vadd.xlane.f32.xlu0 (!%p1757_p9), %v1473_v8 }
 0xa31   : > { %v1758_v37 = vld [vmem:[%s2418_s14] ss:$0 sm:$0xff] (!%p1757_p9) }
 0xa32   : > { %v1759_v39 = vld [vmem:[%s2419_s3] ss:$0 sm:$0xff] (!%p1757_p9) }
 0xab9   : > { %v1472_v20 = vpop.xlane.xlu0 %1471 }
 0xaba   : > { %v1476_v21 = vmul.f32 0.03125, %v1472_v20 }
 0xabc   : > { %v1478_v22 = vsub.f32 %v1456_v15, %v1476_v21 }
 0xabd   : > { %v1475_v23 = vpop.xlane.xlu0 %1474 }
 0xabe   : > { %v1477_v24 = vmul.f32 0.03125, %v1475_v23  ;;  %v1480_v25 = vmul.f32 %v1478_v22, %v1478_v22 }
 0xac0   : > { %v1479_v26 = vsub.f32 %v1457_v19, %v1477_v24  ;;  %v1482_v27 = vsel %vm714_vm2, %v1480_v25, 0.0 }
 0xac1   : > { %1483 = vadd.xlane.f32.xlu1 %v1482_v27 }
 0xac2   : > { %v1481_v28 = vmul.f32 %v1479_v26, %v1479_v26 }
 0xac4   : > { %v1485_v29 = vsel %vm718_vm3, %v1481_v28, 0.0 }
 0xac5   : > { %1486 = vadd.xlane.f32.xlu1 %v1485_v29 }
 0xb4e   : > { %v1484_v30 = vpop.xlane.xlu1 %1483 }
 0xb4f   : > { %v1488_v31 = vmul.f32 0.03125, %v1484_v30 }
 0xb51   : > { %v1490_v32 = vadd.f32 1e-05, %v1488_v31 }
 0xb52   : > { %v1487_v33 = vpop.xlane.xlu1 %1486 }
 0xb53   : > { %1961 = vrsqrt.f32 %v1490_v32  ;;  %v1489_v34 = vmul.f32 0.03125, %v1487_v33 }
 0xb55   : > { %v1491_v35 = vadd.f32 1e-05, %v1489_v34 }
 0xb57   : > { %1963 = vrsqrt.f32 %v1491_v35 }
 0xb5d   : > { %v1962_v36 = vpop.eup %1961 }
 0xb5e   : > { %v1494_v38 = vmul.f32 %v1962_v36, %v1478_v22 }
 0xb60   : > { %v1502_v40 = vmul.f32 %v1758_v37, %v1494_v38 }
 0xb61   : > { %v1964_v41 = vpop.eup %1963 }
 0xb62   : > { %v1510_v42 = vadd.f32 %v1759_v39, %v1502_v40  ;;  %v1495_v43 = vmul.f32 %v1964_v41, %v1479_v26 }
 0xb64   : > { %1512 = vst.msk [vmem:[%s2189_s2] sm:$0xff] %vm714_vm2, %v1510_v42  ;;  %v1503_v44 = vmul.f32 %v1758_v37, %v1495_v43 }
 0xb66   : > { %v1511_v45 = vadd.f32 %v1759_v39, %v1503_v44 }
 0xb68   : > { %1513 = vst.msk [vmem:[%s2189_s2 + $0x8] sm:$0xf] %vm718_vm3, %v1511_v45 }
 0xb69 PF: > { %s2420_s0 = sld [smem:[#allocation7_spill]]  ;;  %s2421_s18 = sld [smem:[#allocation5_spill]] }
 0xb6a   : > { %s2422_s19 = sld [smem:[#allocation6_spill]]  ;;  %s2423_s20 = sld [smem:[#allocation8_spill]] }
 0xb6b   : > { %s2424_s21 = sld [smem:[#allocation9_spill]] }
 0xb6f   : > { %s25_s22 = sadd.s32 1, %s2420_s0  }
 0xb70   : > { %p22_p10 = scmp.ge.s32.totalorder %s25_s22, 6  }
 0xb72   :  { %24 = sbr.rel (!%p22_p10) target bundleno = 8 (0x8), region = 158 }

</bundles_post_ra>
